<compile_context>
chip_gen: v6e
topology: v6e:2x2x1
jax: 0.10.0
libtpu: 0.0.40
codegen_flags: <defaults>
</compile_context>

<pallas_src>
import math

import jax
import jax.numpy as jnp
import numpy as np
from jax.experimental import pallas as pl
from jax.experimental.pallas import tpu as pltpu

# ---- small deterministic configuration (consistent with the module's forward) ----
BATCH = 2
TGT_LEN = 8
SRC_LEN = 8
D_MODEL = 32
D_FF = 64
NUM_HEAD = 4
D_K = D_MODEL // NUM_HEAD
EPS = 1e-5  # nn.LayerNorm default


def _layernorm(x, gamma, beta):
    mean = jnp.mean(x, axis=-1, keepdims=True)
    var = jnp.mean((x - mean) ** 2, axis=-1, keepdims=True)  # biased, like torch
    return (x - mean) * jax.lax.rsqrt(var + EPS) * gamma + beta


def _bf16(x):
    return x.astype(jnp.bfloat16)


# Head split/merge using only lane slices, leading-dim reshapes and concatenation
# (all cheap, robustly-lowered relayouts; the matmuls themselves stay head-batched).
def _split_heads(x2d, seq_len):
    # (B*L, H*Dk) -> (B*H, L, Dk)
    parts = [x2d[:, h * D_K:(h + 1) * D_K].reshape(BATCH, 1, seq_len, D_K)
             for h in range(NUM_HEAD)]
    return jnp.concatenate(parts, axis=1).reshape(BATCH * NUM_HEAD, seq_len, D_K)


def _merge_heads(xh, seq_len):
    # (B*H, L, W) -> (B*L, H*W): rows keyed by (b, l), heads head-major along lanes.
    w = xh.shape[-1]
    x4 = xh.reshape(BATCH, NUM_HEAD, seq_len, w)
    parts = [x4[:, h, :, :].reshape(BATCH * seq_len, w) for h in range(NUM_HEAD)]
    return jnp.concatenate(parts, axis=-1)


def _mha_block(xq2d, xkv2d, neg_mask, w_slab, v_slab, lq, lk, fused_qkv):
    """Multi-head attention + residual + LayerNorm on batch-folded activations.

    xq2d: (B*lq, D) f32, xkv2d: (B*lk, D) f32, neg_mask: (B, lq, lk) additive (0/-1e9)
    w_slab: (D, 4D) = [Wq | Wk | Wv | Wo]
    v_slab: (2, 3D): row0 = [bq|bk|bv]; row1 = [bo | gamma | beta]
    Returns (out (B*lq, D) f32, probs (B*lq, H*lk) f32).
    """
    D = D_MODEL
    bqkv = v_slab[0:1, :]                 # (1, 3D)
    bo = v_slab[1:2, 0:D]                 # (1, D)
    gamma = v_slab[1:2, D:2 * D]          # (1, D)
    beta = v_slab[1:2, 2 * D:3 * D]       # (1, D)

    if fused_qkv:
        # One wide projection matmul: (B*lq, D) @ (D, 3D)
        qkv = jnp.dot(_bf16(xq2d), _bf16(w_slab[:, 0:3 * D]),
                      preferred_element_type=jnp.float32) + bqkv
        q2d, k2d, v2d = qkv[:, 0:D], qkv[:, D:2 * D], qkv[:, 2 * D:3 * D]
    else:
        # Cross-attention: Q from the decoder stream, fused KV from the encoder stream.
        q2d = jnp.dot(_bf16(xq2d), _bf16(w_slab[:, 0:D]),
                      preferred_element_type=jnp.float32) + bqkv[:, 0:D]
        kv = jnp.dot(_bf16(xkv2d), _bf16(w_slab[:, D:3 * D]),
                     preferred_element_type=jnp.float32) + bqkv[:, D:3 * D]
        k2d, v2d = kv[:, 0:D], kv[:, D:2 * D]

    qh = _bf16(_split_heads(q2d, lq))     # (B*H, lq, Dk)
    kh = _bf16(_split_heads(k2d, lk))
    vh = _bf16(_split_heads(v2d, lk))

    # Scaled dot-product attention, all (batch, head) pairs in one batched dot.
    scores = jnp.einsum('nqd,nkd->nqk', qh, kh,
                        preferred_element_type=jnp.float32) * (1.0 / math.sqrt(D_K))
    scores = (scores.reshape(BATCH, NUM_HEAD, lq, lk)
              + neg_mask[:, None, :, :]).reshape(BATCH * NUM_HEAD, lq, lk)

    m = jnp.max(scores, axis=-1, keepdims=True)
    e = jnp.exp(scores - m)
    p = e / jnp.sum(e, axis=-1, keepdims=True)   # exact divide: probs are an output

    ctx = jnp.einsum('nqk,nkd->nqd', _bf16(p), vh,
                     preferred_element_type=jnp.float32)     # (B*H, lq, Dk)
    ctx2d = _merge_heads(ctx, lq)                            # (B*lq, D)

    proj = jnp.dot(_bf16(ctx2d), _bf16(w_slab[:, 3 * D:4 * D]),
                   preferred_element_type=jnp.float32) + bo
    out = _layernorm(proj + xq2d, gamma, beta)

    p_dense = _merge_heads(p, lq)                            # (B*lq, H*lk)
    return out, p_dense


def _ff_block(x2d, w1, w2, v_slab):
    # v_slab: (2, D_FF + D): row0 = [b1 | b2]; row1 = [gamma | beta | pad]
    b1 = v_slab[0:1, 0:D_FF]
    b2 = v_slab[0:1, D_FF:D_FF + D_MODEL]
    gamma = v_slab[1:2, 0:D_MODEL]
    beta = v_slab[1:2, D_MODEL:2 * D_MODEL]
    h = jnp.dot(_bf16(x2d), _bf16(w1), preferred_element_type=jnp.float32) + b1
    h = jnp.maximum(h, 0.0)                                   # ReLU (dropout p=0 -> identity)
    y = jnp.dot(_bf16(h), _bf16(w2), preferred_element_type=jnp.float32) + b2
    return _layernorm(y + x2d, gamma, beta)


# ----------------------------- fused DecoderLayer kernel -----------------------------
def decoder_layer_kernel(dec_ref, enc_ref, smask_ref, xmask_ref,
                         attn_w_ref, attn_v_ref, ffw1_ref, ffw2_ref, ffv_ref,
                         out_ref):
    dec2d = dec_ref[...]      # (B*Lq, D)
    enc2d = enc_ref[...]      # (B*Lk, D)

    h1, sp = _mha_block(dec2d, dec2d, smask_ref[...],
                        attn_w_ref[0], attn_v_ref[0],
                        TGT_LEN, TGT_LEN, fused_qkv=True)
    h2, xp = _mha_block(h1, enc2d, xmask_ref[...],
                        attn_w_ref[1], attn_v_ref[1],
                        TGT_LEN, SRC_LEN, fused_qkv=False)
    out = _ff_block(h2, ffw1_ref[...], ffw2_ref[...], ffv_ref[...])

    # Single lane-dense writeback: [dec_out | self-attn probs | cross-attn probs]
    out_ref[...] = jnp.concatenate([out, sp, xp], axis=-1)


# ------------------------------------ wrapper ------------------------------------
def _pack_attn_params(params):
    wq, bq, wk, bk, wv, bv, wo, bo, gamma, beta = params
    w_slab = jnp.concatenate([wq, wk, wv, wo], axis=1)                 # (D, 4D)
    v_slab = jnp.concatenate(
        [jnp.concatenate([bq, bk, bv], axis=1),                        # (1, 3D)
         jnp.concatenate([bo, gamma, beta], axis=1)], axis=0)          # (2, 3D)
    return w_slab, v_slab


def _pack_ff_params(params):
    w1, b1, w2, b2, gamma, beta = params
    width = D_FF + D_MODEL
    row0 = jnp.concatenate([b1, b2], axis=1)                           # (1, D_FF + D)
    pad = jnp.zeros((1, width - 2 * D_MODEL), jnp.float32)
    row1 = jnp.concatenate([gamma, beta, pad], axis=1)                 # (1, D_FF + D)
    return w1, w2, jnp.concatenate([row0, row1], axis=0)               # (2, D_FF + D)


def decoder_layer_pallas(dec_inputs, enc_outputs, dec_self_attn_mask, dec_enc_attn_mask,
                         self_attn_params, enc_attn_params, ff_params):
    B, Lq, D = dec_inputs.shape
    Lk = enc_outputs.shape[1]
    H = NUM_HEAD

    # Host-side (free) layout plumbing.
    dec2d = dec_inputs.reshape(B * Lq, D)
    enc2d = enc_outputs.reshape(B * Lk, D)
    # Pre-baked additive masks: 1.0 == masked -> add -1e9 (matches masked_fill for O(1) logits).
    smask_add = dec_self_attn_mask.astype(jnp.float32) * jnp.float32(-1e9)
    xmask_add = dec_enc_attn_mask.astype(jnp.float32) * jnp.float32(-1e9)

    sa_w, sa_v = _pack_attn_params(self_attn_params)
    ca_w, ca_v = _pack_attn_params(enc_attn_params)
    attn_w = jnp.stack([sa_w, ca_w], axis=0)      # (2, D, 4D)
    attn_v = jnp.stack([sa_v, ca_v], axis=0)      # (2, 2, 3D)
    ffw1, ffw2, ffv = _pack_ff_params(ff_params)

    args = (dec2d, enc2d, smask_add, xmask_add, attn_w, attn_v, ffw1, ffw2, ffv)

    def full_spec(a):
        nd = a.ndim
        return pl.BlockSpec(a.shape, lambda i, _nd=nd: (0,) * _nd)

    out_w = D + H * Lq + H * Lk
    slab = pl.pallas_call(
        decoder_layer_kernel,
        grid=(1,),                                 # whole layer in one step (batch folded)
        in_specs=[full_spec(a) for a in args],
        out_specs=pl.BlockSpec((B * Lq, out_w), lambda i: (0, 0)),
        out_shape=jax.ShapeDtypeStruct((B * Lq, out_w), jnp.float32),
        compiler_params=pltpu.CompilerParams(dimension_semantics=("arbitrary",)),
    )(*args)

    # Split + reshape the packed result (pure XLA layout work).
    dec_out = slab[:, :D].reshape(B, Lq, D)
    self_prob = slab[:, D:D + H * Lq].reshape(B, Lq, H, Lq).transpose(0, 2, 1, 3)
    enc_prob = slab[:, D + H * Lq:].reshape(B, Lq, H, Lk).transpose(0, 2, 1, 3)
    return dec_out, self_prob, enc_prob


# --------------------------------- references -----------------------------------
def mha_ref(q, k, v, mask, params):
    wq, bq, wk, bk, wv, bv, wo, bo, gamma, beta = params
    B, Lq, D = q.shape
    Lk = k.shape[1]
    qp = (q @ wq + bq).reshape(B, Lq, NUM_HEAD, D_K).transpose(0, 2, 1, 3)
    kp = (k @ wk + bk).reshape(B, Lk, NUM_HEAD, D_K).transpose(0, 2, 1, 3)
    vp = (v @ wv + bv).reshape(B, Lk, NUM_HEAD, D_K).transpose(0, 2, 1, 3)
    scores = jnp.einsum("bhqd,bhkd->bhqk", qp, kp) / math.sqrt(D_K)
    scores = jnp.where(mask[:, None, :, :] > 0.0, -1e9, scores)
    prob = jax.nn.softmax(scores, axis=-1)
    ctx = jnp.einsum("bhqk,bhkd->bhqd", prob, vp)
    ctx = ctx.transpose(0, 2, 1, 3).reshape(B, Lq, D)
    out = ctx @ wo + bo
    return _layernorm(out + q, gamma, beta), prob


def ff_ref(x, params):
    w1, b1, w2, b2, gamma, beta = params
    h = jnp.maximum(x @ w1 + b1, 0.0)
    y = h @ w2 + b2
    return _layernorm(y + x, gamma, beta)


def decoder_layer_ref(dec_inputs, enc_outputs, dec_self_attn_mask, dec_enc_attn_mask,
                      self_attn_params, enc_attn_params, ff_params):
    dec_out, dec_self_attn = mha_ref(dec_inputs, dec_inputs, dec_inputs,
                                     dec_self_attn_mask, self_attn_params)
    dec_out, dec_enc_attn = mha_ref(dec_out, enc_outputs, enc_outputs,
                                    dec_enc_attn_mask, enc_attn_params)
    dec_out = ff_ref(dec_out, ff_params)
    return dec_out, dec_self_attn, dec_enc_attn


# ------------------------------- parameter setup ---------------------------------
def linear_params(key, fan_in, fan_out):
    k1, k2 = jax.random.split(key)
    bound = 1.0 / math.sqrt(fan_in)
    w = jax.random.uniform(k1, (fan_in, fan_out), jnp.float32, -bound, bound)
    b = jax.random.uniform(k2, (1, fan_out), jnp.float32, -bound, bound)
    return w, b


def make_mha_params(key):
    ks = jax.random.split(key, 4)
    wq, bq = linear_params(ks[0], D_MODEL, D_MODEL)
    wk, bk = linear_params(ks[1], D_MODEL, D_MODEL)
    wv, bv = linear_params(ks[2], D_MODEL, D_MODEL)
    wo, bo = linear_params(ks[3], D_MODEL, D_MODEL)
    gamma = jnp.ones((1, D_MODEL), jnp.float32)
    beta = jnp.zeros((1, D_MODEL), jnp.float32)
    return (wq, bq, wk, bk, wv, bv, wo, bo, gamma, beta)


def make_ff_params(key):
    k1, k2 = jax.random.split(key)
    w1, b1 = linear_params(k1, D_MODEL, D_FF)
    w2, b2 = linear_params(k2, D_FF, D_MODEL)
    gamma = jnp.ones((1, D_MODEL), jnp.float32)
    beta = jnp.zeros((1, D_MODEL), jnp.float32)
    return (w1, b1, w2, b2, gamma, beta)


if __name__ == "__main__":
    root = jax.random.PRNGKey(0)
    k_in, k_enc, k_sa, k_ea, k_ff, k_mask = jax.random.split(root, 6)

    dec_inputs = jax.random.normal(k_in, (BATCH, TGT_LEN, D_MODEL), jnp.float32)
    enc_outputs = jax.random.normal(k_enc, (BATCH, SRC_LEN, D_MODEL), jnp.float32)

    # causal self-attention mask (1.0 == masked), broadcast to batch
    causal = jnp.triu(jnp.ones((TGT_LEN, TGT_LEN), jnp.float32), k=1)
    dec_self_attn_mask = jnp.broadcast_to(causal, (BATCH, TGT_LEN, TGT_LEN))
    # cross-attention padding mask: mask last two encoder positions
    pad = jnp.zeros((BATCH, 1, SRC_LEN), jnp.float32).at[:, :, -2:].set(1.0)
    dec_enc_attn_mask = jnp.broadcast_to(pad, (BATCH, TGT_LEN, SRC_LEN))

    self_attn_params = make_mha_params(k_sa)
    enc_attn_params = make_mha_params(k_ea)
    ff_params = make_ff_params(k_ff)

    fwd = jax.jit(decoder_layer_pallas)
    out, self_attn, enc_attn = fwd(
        dec_inputs, enc_outputs, dec_self_attn_mask, dec_enc_attn_mask,
        self_attn_params, enc_attn_params, ff_params)
    jax.block_until_ready((out, self_attn, enc_attn))

    ref_out, ref_self_attn, ref_enc_attn = decoder_layer_ref(
        dec_inputs, enc_outputs, dec_self_attn_mask, dec_enc_attn_mask,
        self_attn_params, enc_attn_params, ff_params)

    # Tolerance accounts for bf16 matmul operands (f32 accumulation) in the kernel
    # vs. the all-f32 pure-JAX reference.
    np.testing.assert_allclose(np.asarray(out), np.asarray(ref_out), rtol=3e-2, atol=3e-2)
    np.testing.assert_allclose(np.asarray(self_attn), np.asarray(ref_self_attn), rtol=3e-2, atol=3e-2)
    np.testing.assert_allclose(np.asarray(enc_attn), np.asarray(ref_enc_attn), rtol=3e-2, atol=3e-2)

    print("KERNEL_OK")
</pallas_src>

<mosaic_0001>
module attributes {stable_mosaic.version = 11 : i64} {
  func.func @decoder_layer_kernel(%arg0: i32, %arg1: memref<16x32xf32, #tpu.memory_space<vmem>>, %arg2: memref<16x32xf32, #tpu.memory_space<vmem>>, %arg3: memref<2x8x8xf32, #tpu.memory_space<vmem>>, %arg4: memref<2x8x8xf32, #tpu.memory_space<vmem>>, %arg5: memref<2x32x128xf32, #tpu.memory_space<vmem>>, %arg6: memref<2x2x96xf32, #tpu.memory_space<vmem>>, %arg7: memref<32x64xf32, #tpu.memory_space<vmem>>, %arg8: memref<64x32xf32, #tpu.memory_space<vmem>>, %arg9: memref<2x96xf32, #tpu.memory_space<vmem>>, %arg10: memref<16x96xf32, #tpu.memory_space<vmem>>) attributes {dimension_semantics = [#tpu.dimension_semantics<arbitrary>], iteration_bounds = array<i64: 1>, scalar_prefetch = 0 : i64, scratch_operands = 0 : i64, tpu.core_type = #tpu.core_type<tc>, window_params = [{pipeline_mode = #tpu.pipeline_mode<synchronous>, transform_indices = @transform_0, window_bounds = array<i64: 16, 32>}, {pipeline_mode = #tpu.pipeline_mode<synchronous>, transform_indices = @transform_1, window_bounds = array<i64: 16, 32>}, {pipeline_mode = #tpu.pipeline_mode<synchronous>, transform_indices = @transform_2, window_bounds = array<i64: 2, 8, 8>}, {pipeline_mode = #tpu.pipeline_mode<synchronous>, transform_indices = @transform_3, window_bounds = array<i64: 2, 8, 8>}, {pipeline_mode = #tpu.pipeline_mode<synchronous>, transform_indices = @transform_4, window_bounds = array<i64: 2, 32, 128>}, {pipeline_mode = #tpu.pipeline_mode<synchronous>, transform_indices = @transform_5, window_bounds = array<i64: 2, 2, 96>}, {pipeline_mode = #tpu.pipeline_mode<synchronous>, transform_indices = @transform_6, window_bounds = array<i64: 32, 64>}, {pipeline_mode = #tpu.pipeline_mode<synchronous>, transform_indices = @transform_7, window_bounds = array<i64: 64, 32>}, {pipeline_mode = #tpu.pipeline_mode<synchronous>, transform_indices = @transform_8, window_bounds = array<i64: 2, 96>}, {pipeline_mode = #tpu.pipeline_mode<synchronous>, transform_indices = @transform_9, window_bounds = array<i64: 16, 96>}]} {
    %c0 = arith.constant 0 : index
    %c0_0 = arith.constant 0 : index
    %0 = vector.load %arg1[%c0, %c0_0] : memref<16x32xf32, #tpu.memory_space<vmem>>, vector<16x32xf32>
    %c0_1 = arith.constant 0 : index
    %c0_2 = arith.constant 0 : index
    %1 = vector.load %arg2[%c0_1, %c0_2] : memref<16x32xf32, #tpu.memory_space<vmem>>, vector<16x32xf32>
    %c0_3 = arith.constant 0 : index
    %c0_4 = arith.constant 0 : index
    %c0_5 = arith.constant 0 : index
    %2 = vector.load %arg3[%c0_3, %c0_4, %c0_5] : memref<2x8x8xf32, #tpu.memory_space<vmem>>, vector<2x8x8xf32>
    %c0_6 = arith.constant 0 : index
    %c0_7 = arith.constant 0 : index
    %c0_8 = arith.constant 0 : index
    %3 = vector.load %arg5[%c0_6, %c0_7, %c0_8] : memref<2x32x128xf32, #tpu.memory_space<vmem>>, vector<1x32x128xf32>
    %4 = vector.shape_cast %3 : vector<1x32x128xf32> to vector<32x128xf32>
    %c0_9 = arith.constant 0 : index
    %c0_10 = arith.constant 0 : index
    %c0_11 = arith.constant 0 : index
    %5 = vector.load %arg6[%c0_9, %c0_10, %c0_11] : memref<2x2x96xf32, #tpu.memory_space<vmem>>, vector<1x2x96xf32>
    %6 = vector.shape_cast %5 : vector<1x2x96xf32> to vector<2x96xf32>
    %7 = vector.extract_strided_slice %6 {offsets = [0, 0], sizes = [1, 96], strides = [1, 1]} : vector<2x96xf32> to vector<1x96xf32>
    %8 = vector.extract_strided_slice %6 {offsets = [1, 0], sizes = [1, 32], strides = [1, 1]} : vector<2x96xf32> to vector<1x32xf32>
    %9 = vector.extract_strided_slice %6 {offsets = [1, 32], sizes = [1, 32], strides = [1, 1]} : vector<2x96xf32> to vector<1x32xf32>
    %10 = vector.extract_strided_slice %6 {offsets = [1, 64], sizes = [1, 32], strides = [1, 1]} : vector<2x96xf32> to vector<1x32xf32>
    %11 = arith.truncf %0 : vector<16x32xf32> to vector<16x32xbf16>
    %12 = vector.extract_strided_slice %4 {offsets = [0, 0], sizes = [32, 96], strides = [1, 1]} : vector<32x128xf32> to vector<32x96xf32>
    %13 = arith.truncf %12 : vector<32x96xf32> to vector<32x96xbf16>
    %cst = arith.constant dense<0.000000e+00> : vector<16x96xf32>
    %14 = tpu.matmul %11, %13, %cst {dimension_numbers = #tpu.dot_dimension_numbers<[1], [0], [0], [1], [0, 0, 1, 1], [], []>} : vector<16x32xbf16>, vector<32x96xbf16>, vector<16x96xf32> -> vector<16x96xf32>
    %15 = vector.broadcast %7 : vector<1x96xf32> to vector<16x96xf32>
    %16 = arith.addf %14, %15 : vector<16x96xf32>
    %17 = vector.extract_strided_slice %16 {offsets = [0, 0], sizes = [16, 32], strides = [1, 1]} : vector<16x96xf32> to vector<16x32xf32>
    %18 = vector.extract_strided_slice %16 {offsets = [0, 32], sizes = [16, 32], strides = [1, 1]} : vector<16x96xf32> to vector<16x32xf32>
    %19 = vector.extract_strided_slice %16 {offsets = [0, 64], sizes = [16, 32], strides = [1, 1]} : vector<16x96xf32> to vector<16x32xf32>
    %20 = vector.extract_strided_slice %17 {offsets = [0, 0], sizes = [16, 8], strides = [1, 1]} : vector<16x32xf32> to vector<16x8xf32>
    %21 = vector.shape_cast %20 : vector<16x8xf32> to vector<2x1x8x8xf32>
    %22 = vector.extract_strided_slice %17 {offsets = [0, 8], sizes = [16, 8], strides = [1, 1]} : vector<16x32xf32> to vector<16x8xf32>
    %23 = vector.shape_cast %22 : vector<16x8xf32> to vector<2x1x8x8xf32>
    %24 = vector.extract_strided_slice %17 {offsets = [0, 16], sizes = [16, 8], strides = [1, 1]} : vector<16x32xf32> to vector<16x8xf32>
    %25 = vector.shape_cast %24 : vector<16x8xf32> to vector<2x1x8x8xf32>
    %26 = vector.extract_strided_slice %17 {offsets = [0, 24], sizes = [16, 8], strides = [1, 1]} : vector<16x32xf32> to vector<16x8xf32>
    %27 = vector.shape_cast %26 : vector<16x8xf32> to vector<2x1x8x8xf32>
    %28 = tpu.concatenate %21, %23, %25, %27 in 1 : vector<2x1x8x8xf32>, vector<2x1x8x8xf32>, vector<2x1x8x8xf32>, vector<2x1x8x8xf32> -> vector<2x4x8x8xf32>
    %29 = vector.shape_cast %28 : vector<2x4x8x8xf32> to vector<8x8x8xf32>
    %30 = arith.truncf %29 : vector<8x8x8xf32> to vector<8x8x8xbf16>
    %31 = vector.extract_strided_slice %18 {offsets = [0, 0], sizes = [16, 8], strides = [1, 1]} : vector<16x32xf32> to vector<16x8xf32>
    %32 = vector.shape_cast %31 : vector<16x8xf32> to vector<2x1x8x8xf32>
    %33 = vector.extract_strided_slice %18 {offsets = [0, 8], sizes = [16, 8], strides = [1, 1]} : vector<16x32xf32> to vector<16x8xf32>
    %34 = vector.shape_cast %33 : vector<16x8xf32> to vector<2x1x8x8xf32>
    %35 = vector.extract_strided_slice %18 {offsets = [0, 16], sizes = [16, 8], strides = [1, 1]} : vector<16x32xf32> to vector<16x8xf32>
    %36 = vector.shape_cast %35 : vector<16x8xf32> to vector<2x1x8x8xf32>
    %37 = vector.extract_strided_slice %18 {offsets = [0, 24], sizes = [16, 8], strides = [1, 1]} : vector<16x32xf32> to vector<16x8xf32>
    %38 = vector.shape_cast %37 : vector<16x8xf32> to vector<2x1x8x8xf32>
    %39 = tpu.concatenate %32, %34, %36, %38 in 1 : vector<2x1x8x8xf32>, vector<2x1x8x8xf32>, vector<2x1x8x8xf32>, vector<2x1x8x8xf32> -> vector<2x4x8x8xf32>
    %40 = vector.shape_cast %39 : vector<2x4x8x8xf32> to vector<8x8x8xf32>
    %41 = arith.truncf %40 : vector<8x8x8xf32> to vector<8x8x8xbf16>
    %42 = vector.extract_strided_slice %19 {offsets = [0, 0], sizes = [16, 8], strides = [1, 1]} : vector<16x32xf32> to vector<16x8xf32>
    %43 = vector.shape_cast %42 : vector<16x8xf32> to vector<2x1x8x8xf32>
    %44 = vector.extract_strided_slice %19 {offsets = [0, 8], sizes = [16, 8], strides = [1, 1]} : vector<16x32xf32> to vector<16x8xf32>
    %45 = vector.shape_cast %44 : vector<16x8xf32> to vector<2x1x8x8xf32>
    %46 = vector.extract_strided_slice %19 {offsets = [0, 16], sizes = [16, 8], strides = [1, 1]} : vector<16x32xf32> to vector<16x8xf32>
    %47 = vector.shape_cast %46 : vector<16x8xf32> to vector<2x1x8x8xf32>
    %48 = vector.extract_strided_slice %19 {offsets = [0, 24], sizes = [16, 8], strides = [1, 1]} : vector<16x32xf32> to vector<16x8xf32>
    %49 = vector.shape_cast %48 : vector<16x8xf32> to vector<2x1x8x8xf32>
    %50 = tpu.concatenate %43, %45, %47, %49 in 1 : vector<2x1x8x8xf32>, vector<2x1x8x8xf32>, vector<2x1x8x8xf32>, vector<2x1x8x8xf32> -> vector<2x4x8x8xf32>
    %51 = vector.shape_cast %50 : vector<2x4x8x8xf32> to vector<8x8x8xf32>
    %52 = arith.truncf %51 : vector<8x8x8xf32> to vector<8x8x8xbf16>
    "tpu.trace_start"() <{level = 10 : i32, message = "nqd,nkd->nqk"}> : () -> ()
    %cst_12 = arith.constant dense<0.000000e+00> : vector<8x8x8xf32>
    %53 = tpu.matmul %30, %41, %cst_12 {dimension_numbers = #tpu.dot_dimension_numbers<[2], [2], [1], [1], [0, 0, 0, 1, 1, 1], [0], [0]>} : vector<8x8x8xbf16>, vector<8x8x8xbf16>, vector<8x8x8xf32> -> vector<8x8x8xf32>
    "tpu.trace_stop"() : () -> ()
    %cst_13 = arith.constant 0.353553385 : f32
    %54 = vector.broadcast %cst_13 : f32 to vector<8x8x8xf32>
    %55 = arith.mulf %53, %54 : vector<8x8x8xf32>
    %56 = vector.shape_cast %55 : vector<8x8x8xf32> to vector<2x4x8x8xf32>
    %57 = vector.shape_cast %2 : vector<2x8x8xf32> to vector<2x1x8x8xf32>
    %58 = vector.broadcast %57 : vector<2x1x8x8xf32> to vector<2x4x8x8xf32>
    %59 = arith.addf %56, %58 : vector<2x4x8x8xf32>
    %60 = vector.shape_cast %59 : vector<2x4x8x8xf32> to vector<8x8x8xf32>
    %cst_14 = arith.constant dense<0xFF800000> : vector<8x8xf32>
    %61 = vector.multi_reduction <maximumf>, %60, %cst_14 [2] : vector<8x8x8xf32> to vector<8x8xf32>
    %62 = vector.shape_cast %61 : vector<8x8xf32> to vector<8x8x1xf32>
    %63 = vector.broadcast %62 : vector<8x8x1xf32> to vector<8x8x8xf32>
    %64 = arith.subf %60, %63 : vector<8x8x8xf32>
    %65 = math.exp %64 : vector<8x8x8xf32>
    %cst_15 = arith.constant dense<0.000000e+00> : vector<8x8xf32>
    %66 = vector.multi_reduction <add>, %65, %cst_15 [2] : vector<8x8x8xf32> to vector<8x8xf32>
    %67 = vector.shape_cast %66 : vector<8x8xf32> to vector<8x8x1xf32>
    %68 = vector.broadcast %67 : vector<8x8x1xf32> to vector<8x8x8xf32>
    %69 = arith.divf %65, %68 : vector<8x8x8xf32>
    %70 = arith.truncf %69 : vector<8x8x8xf32> to vector<8x8x8xbf16>
    "tpu.trace_start"() <{level = 10 : i32, message = "nqk,nkd->nqd"}> : () -> ()
    %cst_16 = arith.constant dense<0.000000e+00> : vector<8x8x8xf32>
    %71 = tpu.matmul %70, %52, %cst_16 {dimension_numbers = #tpu.dot_dimension_numbers<[2], [1], [1], [2], [0, 0, 0, 1, 1, 2], [0], [0]>} : vector<8x8x8xbf16>, vector<8x8x8xbf16>, vector<8x8x8xf32> -> vector<8x8x8xf32>
    "tpu.trace_stop"() : () -> ()
    %72 = vector.shape_cast %71 : vector<8x8x8xf32> to vector<2x4x8x8xf32>
    %73 = vector.extract_strided_slice %72 {offsets = [0, 0, 0, 0], sizes = [2, 1, 8, 8], strides = [1, 1, 1, 1]} : vector<2x4x8x8xf32> to vector<2x1x8x8xf32>
    %74 = vector.shape_cast %73 : vector<2x1x8x8xf32> to vector<2x8x8xf32>
    %75 = vector.shape_cast %74 : vector<2x8x8xf32> to vector<16x8xf32>
    %76 = vector.extract_strided_slice %72 {offsets = [0, 1, 0, 0], sizes = [2, 1, 8, 8], strides = [1, 1, 1, 1]} : vector<2x4x8x8xf32> to vector<2x1x8x8xf32>
    %77 = vector.shape_cast %76 : vector<2x1x8x8xf32> to vector<2x8x8xf32>
    %78 = vector.shape_cast %77 : vector<2x8x8xf32> to vector<16x8xf32>
    %79 = vector.extract_strided_slice %72 {offsets = [0, 2, 0, 0], sizes = [2, 1, 8, 8], strides = [1, 1, 1, 1]} : vector<2x4x8x8xf32> to vector<2x1x8x8xf32>
    %80 = vector.shape_cast %79 : vector<2x1x8x8xf32> to vector<2x8x8xf32>
    %81 = vector.shape_cast %80 : vector<2x8x8xf32> to vector<16x8xf32>
    %82 = vector.extract_strided_slice %72 {offsets = [0, 3, 0, 0], sizes = [2, 1, 8, 8], strides = [1, 1, 1, 1]} : vector<2x4x8x8xf32> to vector<2x1x8x8xf32>
    %83 = vector.shape_cast %82 : vector<2x1x8x8xf32> to vector<2x8x8xf32>
    %84 = vector.shape_cast %83 : vector<2x8x8xf32> to vector<16x8xf32>
    %85 = tpu.concatenate %75, %78, %81, %84 in 1 : vector<16x8xf32>, vector<16x8xf32>, vector<16x8xf32>, vector<16x8xf32> -> vector<16x32xf32>
    %86 = arith.truncf %85 : vector<16x32xf32> to vector<16x32xbf16>
    %87 = vector.extract_strided_slice %4 {offsets = [0, 96], sizes = [32, 32], strides = [1, 1]} : vector<32x128xf32> to vector<32x32xf32>
    %88 = arith.truncf %87 : vector<32x32xf32> to vector<32x32xbf16>
    %cst_17 = arith.constant dense<0.000000e+00> : vector<16x32xf32>
    %89 = tpu.matmul %86, %88, %cst_17 {dimension_numbers = #tpu.dot_dimension_numbers<[1], [0], [0], [1], [0, 0, 1, 1], [], []>} : vector<16x32xbf16>, vector<32x32xbf16>, vector<16x32xf32> -> vector<16x32xf32>
    %90 = vector.broadcast %8 : vector<1x32xf32> to vector<16x32xf32>
    %91 = arith.addf %89, %90 : vector<16x32xf32>
    %92 = arith.addf %91, %0 : vector<16x32xf32>
    %cst_18 = arith.constant dense<0.000000e+00> : vector<16xf32>
    %93 = vector.multi_reduction <add>, %92, %cst_18 [1] : vector<16x32xf32> to vector<16xf32>
    %94 = vector.shape_cast %93 : vector<16xf32> to vector<16x1xf32>
    %cst_19 = arith.constant 3.200000e+01 : f32
    %95 = vector.broadcast %cst_19 : f32 to vector<16x1xf32>
    %96 = arith.divf %94, %95 : vector<16x1xf32>
    %97 = vector.broadcast %96 : vector<16x1xf32> to vector<16x32xf32>
    %98 = arith.subf %92, %97 : vector<16x32xf32>
    %99 = arith.mulf %98, %98 : vector<16x32xf32>
    %cst_20 = arith.constant dense<0.000000e+00> : vector<16xf32>
    %100 = vector.multi_reduction <add>, %99, %cst_20 [1] : vector<16x32xf32> to vector<16xf32>
    %101 = vector.shape_cast %100 : vector<16xf32> to vector<16x1xf32>
    %cst_21 = arith.constant 3.200000e+01 : f32
    %102 = vector.broadcast %cst_21 : f32 to vector<16x1xf32>
    %103 = arith.divf %101, %102 : vector<16x1xf32>
    %104 = vector.broadcast %96 : vector<16x1xf32> to vector<16x32xf32>
    %105 = arith.subf %92, %104 : vector<16x32xf32>
    %cst_22 = arith.constant 9.99999974E-6 : f32
    %106 = vector.broadcast %cst_22 : f32 to vector<16x1xf32>
    %107 = arith.addf %103, %106 : vector<16x1xf32>
    %108 = math.rsqrt %107 : vector<16x1xf32>
    %109 = vector.broadcast %108 : vector<16x1xf32> to vector<16x32xf32>
    %110 = arith.mulf %105, %109 : vector<16x32xf32>
    %111 = vector.broadcast %9 : vector<1x32xf32> to vector<16x32xf32>
    %112 = arith.mulf %110, %111 : vector<16x32xf32>
    %113 = vector.broadcast %10 : vector<1x32xf32> to vector<16x32xf32>
    %114 = arith.addf %112, %113 : vector<16x32xf32>
    %115 = vector.shape_cast %69 : vector<8x8x8xf32> to vector<2x4x8x8xf32>
    %116 = vector.extract_strided_slice %115 {offsets = [0, 0, 0, 0], sizes = [2, 1, 8, 8], strides = [1, 1, 1, 1]} : vector<2x4x8x8xf32> to vector<2x1x8x8xf32>
    %117 = vector.shape_cast %116 : vector<2x1x8x8xf32> to vector<2x8x8xf32>
    %118 = vector.shape_cast %117 : vector<2x8x8xf32> to vector<16x8xf32>
    %119 = vector.extract_strided_slice %115 {offsets = [0, 1, 0, 0], sizes = [2, 1, 8, 8], strides = [1, 1, 1, 1]} : vector<2x4x8x8xf32> to vector<2x1x8x8xf32>
    %120 = vector.shape_cast %119 : vector<2x1x8x8xf32> to vector<2x8x8xf32>
    %121 = vector.shape_cast %120 : vector<2x8x8xf32> to vector<16x8xf32>
    %122 = vector.extract_strided_slice %115 {offsets = [0, 2, 0, 0], sizes = [2, 1, 8, 8], strides = [1, 1, 1, 1]} : vector<2x4x8x8xf32> to vector<2x1x8x8xf32>
    %123 = vector.shape_cast %122 : vector<2x1x8x8xf32> to vector<2x8x8xf32>
    %124 = vector.shape_cast %123 : vector<2x8x8xf32> to vector<16x8xf32>
    %125 = vector.extract_strided_slice %115 {offsets = [0, 3, 0, 0], sizes = [2, 1, 8, 8], strides = [1, 1, 1, 1]} : vector<2x4x8x8xf32> to vector<2x1x8x8xf32>
    %126 = vector.shape_cast %125 : vector<2x1x8x8xf32> to vector<2x8x8xf32>
    %127 = vector.shape_cast %126 : vector<2x8x8xf32> to vector<16x8xf32>
    %128 = tpu.concatenate %118, %121, %124, %127 in 1 : vector<16x8xf32>, vector<16x8xf32>, vector<16x8xf32>, vector<16x8xf32> -> vector<16x32xf32>
    %c0_23 = arith.constant 0 : index
    %c0_24 = arith.constant 0 : index
    %c0_25 = arith.constant 0 : index
    %129 = vector.load %arg4[%c0_23, %c0_24, %c0_25] : memref<2x8x8xf32, #tpu.memory_space<vmem>>, vector<2x8x8xf32>
    %c1 = arith.constant 1 : index
    %c0_26 = arith.constant 0 : index
    %c0_27 = arith.constant 0 : index
    %130 = vector.load %arg5[%c1, %c0_26, %c0_27] : memref<2x32x128xf32, #tpu.memory_space<vmem>>, vector<1x32x128xf32>
    %131 = vector.shape_cast %130 : vector<1x32x128xf32> to vector<32x128xf32>
    %c1_28 = arith.constant 1 : index
    %c0_29 = arith.constant 0 : index
    %c0_30 = arith.constant 0 : index
    %132 = vector.load %arg6[%c1_28, %c0_29, %c0_30] : memref<2x2x96xf32, #tpu.memory_space<vmem>>, vector<1x2x96xf32>
    %133 = vector.shape_cast %132 : vector<1x2x96xf32> to vector<2x96xf32>
    %134 = vector.extract_strided_slice %133 {offsets = [0, 0], sizes = [1, 96], strides = [1, 1]} : vector<2x96xf32> to vector<1x96xf32>
    %135 = vector.extract_strided_slice %133 {offsets = [1, 0], sizes = [1, 32], strides = [1, 1]} : vector<2x96xf32> to vector<1x32xf32>
    %136 = vector.extract_strided_slice %133 {offsets = [1, 32], sizes = [1, 32], strides = [1, 1]} : vector<2x96xf32> to vector<1x32xf32>
    %137 = vector.extract_strided_slice %133 {offsets = [1, 64], sizes = [1, 32], strides = [1, 1]} : vector<2x96xf32> to vector<1x32xf32>
    %138 = arith.truncf %114 : vector<16x32xf32> to vector<16x32xbf16>
    %139 = vector.extract_strided_slice %131 {offsets = [0, 0], sizes = [32, 32], strides = [1, 1]} : vector<32x128xf32> to vector<32x32xf32>
    %140 = arith.truncf %139 : vector<32x32xf32> to vector<32x32xbf16>
    %cst_31 = arith.constant dense<0.000000e+00> : vector<16x32xf32>
    %141 = tpu.matmul %138, %140, %cst_31 {dimension_numbers = #tpu.dot_dimension_numbers<[1], [0], [0], [1], [0, 0, 1, 1], [], []>} : vector<16x32xbf16>, vector<32x32xbf16>, vector<16x32xf32> -> vector<16x32xf32>
    %142 = vector.extract_strided_slice %134 {offsets = [0, 0], sizes = [1, 32], strides = [1, 1]} : vector<1x96xf32> to vector<1x32xf32>
    %143 = vector.broadcast %142 : vector<1x32xf32> to vector<16x32xf32>
    %144 = arith.addf %141, %143 : vector<16x32xf32>
    %145 = arith.truncf %1 : vector<16x32xf32> to vector<16x32xbf16>
    %146 = vector.extract_strided_slice %131 {offsets = [0, 32], sizes = [32, 64], strides = [1, 1]} : vector<32x128xf32> to vector<32x64xf32>
    %147 = arith.truncf %146 : vector<32x64xf32> to vector<32x64xbf16>
    %cst_32 = arith.constant dense<0.000000e+00> : vector<16x64xf32>
    %148 = tpu.matmul %145, %147, %cst_32 {dimension_numbers = #tpu.dot_dimension_numbers<[1], [0], [0], [1], [0, 0, 1, 1], [], []>} : vector<16x32xbf16>, vector<32x64xbf16>, vector<16x64xf32> -> vector<16x64xf32>
    %149 = vector.extract_strided_slice %134 {offsets = [0, 32], sizes = [1, 64], strides = [1, 1]} : vector<1x96xf32> to vector<1x64xf32>
    %150 = vector.broadcast %149 : vector<1x64xf32> to vector<16x64xf32>
    %151 = arith.addf %148, %150 : vector<16x64xf32>
    %152 = vector.extract_strided_slice %151 {offsets = [0, 0], sizes = [16, 32], strides = [1, 1]} : vector<16x64xf32> to vector<16x32xf32>
    %153 = vector.extract_strided_slice %151 {offsets = [0, 32], sizes = [16, 32], strides = [1, 1]} : vector<16x64xf32> to vector<16x32xf32>
    %154 = vector.extract_strided_slice %144 {offsets = [0, 0], sizes = [16, 8], strides = [1, 1]} : vector<16x32xf32> to vector<16x8xf32>
    %155 = vector.shape_cast %154 : vector<16x8xf32> to vector<2x1x8x8xf32>
    %156 = vector.extract_strided_slice %144 {offsets = [0, 8], sizes = [16, 8], strides = [1, 1]} : vector<16x32xf32> to vector<16x8xf32>
    %157 = vector.shape_cast %156 : vector<16x8xf32> to vector<2x1x8x8xf32>
    %158 = vector.extract_strided_slice %144 {offsets = [0, 16], sizes = [16, 8], strides = [1, 1]} : vector<16x32xf32> to vector<16x8xf32>
    %159 = vector.shape_cast %158 : vector<16x8xf32> to vector<2x1x8x8xf32>
    %160 = vector.extract_strided_slice %144 {offsets = [0, 24], sizes = [16, 8], strides = [1, 1]} : vector<16x32xf32> to vector<16x8xf32>
    %161 = vector.shape_cast %160 : vector<16x8xf32> to vector<2x1x8x8xf32>
    %162 = tpu.concatenate %155, %157, %159, %161 in 1 : vector<2x1x8x8xf32>, vector<2x1x8x8xf32>, vector<2x1x8x8xf32>, vector<2x1x8x8xf32> -> vector<2x4x8x8xf32>
    %163 = vector.shape_cast %162 : vector<2x4x8x8xf32> to vector<8x8x8xf32>
    %164 = arith.truncf %163 : vector<8x8x8xf32> to vector<8x8x8xbf16>
    %165 = vector.extract_strided_slice %152 {offsets = [0, 0], sizes = [16, 8], strides = [1, 1]} : vector<16x32xf32> to vector<16x8xf32>
    %166 = vector.shape_cast %165 : vector<16x8xf32> to vector<2x1x8x8xf32>
    %167 = vector.extract_strided_slice %152 {offsets = [0, 8], sizes = [16, 8], strides = [1, 1]} : vector<16x32xf32> to vector<16x8xf32>
    %168 = vector.shape_cast %167 : vector<16x8xf32> to vector<2x1x8x8xf32>
    %169 = vector.extract_strided_slice %152 {offsets = [0, 16], sizes = [16, 8], strides = [1, 1]} : vector<16x32xf32> to vector<16x8xf32>
    %170 = vector.shape_cast %169 : vector<16x8xf32> to vector<2x1x8x8xf32>
    %171 = vector.extract_strided_slice %152 {offsets = [0, 24], sizes = [16, 8], strides = [1, 1]} : vector<16x32xf32> to vector<16x8xf32>
    %172 = vector.shape_cast %171 : vector<16x8xf32> to vector<2x1x8x8xf32>
    %173 = tpu.concatenate %166, %168, %170, %172 in 1 : vector<2x1x8x8xf32>, vector<2x1x8x8xf32>, vector<2x1x8x8xf32>, vector<2x1x8x8xf32> -> vector<2x4x8x8xf32>
    %174 = vector.shape_cast %173 : vector<2x4x8x8xf32> to vector<8x8x8xf32>
    %175 = arith.truncf %174 : vector<8x8x8xf32> to vector<8x8x8xbf16>
    %176 = vector.extract_strided_slice %153 {offsets = [0, 0], sizes = [16, 8], strides = [1, 1]} : vector<16x32xf32> to vector<16x8xf32>
    %177 = vector.shape_cast %176 : vector<16x8xf32> to vector<2x1x8x8xf32>
    %178 = vector.extract_strided_slice %153 {offsets = [0, 8], sizes = [16, 8], strides = [1, 1]} : vector<16x32xf32> to vector<16x8xf32>
    %179 = vector.shape_cast %178 : vector<16x8xf32> to vector<2x1x8x8xf32>
    %180 = vector.extract_strided_slice %153 {offsets = [0, 16], sizes = [16, 8], strides = [1, 1]} : vector<16x32xf32> to vector<16x8xf32>
    %181 = vector.shape_cast %180 : vector<16x8xf32> to vector<2x1x8x8xf32>
    %182 = vector.extract_strided_slice %153 {offsets = [0, 24], sizes = [16, 8], strides = [1, 1]} : vector<16x32xf32> to vector<16x8xf32>
    %183 = vector.shape_cast %182 : vector<16x8xf32> to vector<2x1x8x8xf32>
    %184 = tpu.concatenate %177, %179, %181, %183 in 1 : vector<2x1x8x8xf32>, vector<2x1x8x8xf32>, vector<2x1x8x8xf32>, vector<2x1x8x8xf32> -> vector<2x4x8x8xf32>
    %185 = vector.shape_cast %184 : vector<2x4x8x8xf32> to vector<8x8x8xf32>
    %186 = arith.truncf %185 : vector<8x8x8xf32> to vector<8x8x8xbf16>
    "tpu.trace_start"() <{level = 10 : i32, message = "nqd,nkd->nqk"}> : () -> ()
    %cst_33 = arith.constant dense<0.000000e+00> : vector<8x8x8xf32>
    %187 = tpu.matmul %164, %175, %cst_33 {dimension_numbers = #tpu.dot_dimension_numbers<[2], [2], [1], [1], [0, 0, 0, 1, 1, 1], [0], [0]>} : vector<8x8x8xbf16>, vector<8x8x8xbf16>, vector<8x8x8xf32> -> vector<8x8x8xf32>
    "tpu.trace_stop"() : () -> ()
    %cst_34 = arith.constant 0.353553385 : f32
    %188 = vector.broadcast %cst_34 : f32 to vector<8x8x8xf32>
    %189 = arith.mulf %187, %188 : vector<8x8x8xf32>
    %190 = vector.shape_cast %189 : vector<8x8x8xf32> to vector<2x4x8x8xf32>
    %191 = vector.shape_cast %129 : vector<2x8x8xf32> to vector<2x1x8x8xf32>
    %192 = vector.broadcast %191 : vector<2x1x8x8xf32> to vector<2x4x8x8xf32>
    %193 = arith.addf %190, %192 : vector<2x4x8x8xf32>
    %194 = vector.shape_cast %193 : vector<2x4x8x8xf32> to vector<8x8x8xf32>
    %cst_35 = arith.constant dense<0xFF800000> : vector<8x8xf32>
    %195 = vector.multi_reduction <maximumf>, %194, %cst_35 [2] : vector<8x8x8xf32> to vector<8x8xf32>
    %196 = vector.shape_cast %195 : vector<8x8xf32> to vector<8x8x1xf32>
    %197 = vector.broadcast %196 : vector<8x8x1xf32> to vector<8x8x8xf32>
    %198 = arith.subf %194, %197 : vector<8x8x8xf32>
    %199 = math.exp %198 : vector<8x8x8xf32>
    %cst_36 = arith.constant dense<0.000000e+00> : vector<8x8xf32>
    %200 = vector.multi_reduction <add>, %199, %cst_36 [2] : vector<8x8x8xf32> to vector<8x8xf32>
    %201 = vector.shape_cast %200 : vector<8x8xf32> to vector<8x8x1xf32>
    %202 = vector.broadcast %201 : vector<8x8x1xf32> to vector<8x8x8xf32>
    %203 = arith.divf %199, %202 : vector<8x8x8xf32>
    %204 = arith.truncf %203 : vector<8x8x8xf32> to vector<8x8x8xbf16>
    "tpu.trace_start"() <{level = 10 : i32, message = "nqk,nkd->nqd"}> : () -> ()
    %cst_37 = arith.constant dense<0.000000e+00> : vector<8x8x8xf32>
    %205 = tpu.matmul %204, %186, %cst_37 {dimension_numbers = #tpu.dot_dimension_numbers<[2], [1], [1], [2], [0, 0, 0, 1, 1, 2], [0], [0]>} : vector<8x8x8xbf16>, vector<8x8x8xbf16>, vector<8x8x8xf32> -> vector<8x8x8xf32>
    "tpu.trace_stop"() : () -> ()
    %206 = vector.shape_cast %205 : vector<8x8x8xf32> to vector<2x4x8x8xf32>
    %207 = vector.extract_strided_slice %206 {offsets = [0, 0, 0, 0], sizes = [2, 1, 8, 8], strides = [1, 1, 1, 1]} : vector<2x4x8x8xf32> to vector<2x1x8x8xf32>
    %208 = vector.shape_cast %207 : vector<2x1x8x8xf32> to vector<2x8x8xf32>
    %209 = vector.shape_cast %208 : vector<2x8x8xf32> to vector<16x8xf32>
    %210 = vector.extract_strided_slice %206 {offsets = [0, 1, 0, 0], sizes = [2, 1, 8, 8], strides = [1, 1, 1, 1]} : vector<2x4x8x8xf32> to vector<2x1x8x8xf32>
    %211 = vector.shape_cast %210 : vector<2x1x8x8xf32> to vector<2x8x8xf32>
    %212 = vector.shape_cast %211 : vector<2x8x8xf32> to vector<16x8xf32>
    %213 = vector.extract_strided_slice %206 {offsets = [0, 2, 0, 0], sizes = [2, 1, 8, 8], strides = [1, 1, 1, 1]} : vector<2x4x8x8xf32> to vector<2x1x8x8xf32>
    %214 = vector.shape_cast %213 : vector<2x1x8x8xf32> to vector<2x8x8xf32>
    %215 = vector.shape_cast %214 : vector<2x8x8xf32> to vector<16x8xf32>
    %216 = vector.extract_strided_slice %206 {offsets = [0, 3, 0, 0], sizes = [2, 1, 8, 8], strides = [1, 1, 1, 1]} : vector<2x4x8x8xf32> to vector<2x1x8x8xf32>
    %217 = vector.shape_cast %216 : vector<2x1x8x8xf32> to vector<2x8x8xf32>
    %218 = vector.shape_cast %217 : vector<2x8x8xf32> to vector<16x8xf32>
    %219 = tpu.concatenate %209, %212, %215, %218 in 1 : vector<16x8xf32>, vector<16x8xf32>, vector<16x8xf32>, vector<16x8xf32> -> vector<16x32xf32>
    %220 = arith.truncf %219 : vector<16x32xf32> to vector<16x32xbf16>
    %221 = vector.extract_strided_slice %131 {offsets = [0, 96], sizes = [32, 32], strides = [1, 1]} : vector<32x128xf32> to vector<32x32xf32>
    %222 = arith.truncf %221 : vector<32x32xf32> to vector<32x32xbf16>
    %cst_38 = arith.constant dense<0.000000e+00> : vector<16x32xf32>
    %223 = tpu.matmul %220, %222, %cst_38 {dimension_numbers = #tpu.dot_dimension_numbers<[1], [0], [0], [1], [0, 0, 1, 1], [], []>} : vector<16x32xbf16>, vector<32x32xbf16>, vector<16x32xf32> -> vector<16x32xf32>
    %224 = vector.broadcast %135 : vector<1x32xf32> to vector<16x32xf32>
    %225 = arith.addf %223, %224 : vector<16x32xf32>
    %226 = arith.addf %225, %114 : vector<16x32xf32>
    %cst_39 = arith.constant dense<0.000000e+00> : vector<16xf32>
    %227 = vector.multi_reduction <add>, %226, %cst_39 [1] : vector<16x32xf32> to vector<16xf32>
    %228 = vector.shape_cast %227 : vector<16xf32> to vector<16x1xf32>
    %cst_40 = arith.constant 3.200000e+01 : f32
    %229 = vector.broadcast %cst_40 : f32 to vector<16x1xf32>
    %230 = arith.divf %228, %229 : vector<16x1xf32>
    %231 = vector.broadcast %230 : vector<16x1xf32> to vector<16x32xf32>
    %232 = arith.subf %226, %231 : vector<16x32xf32>
    %233 = arith.mulf %232, %232 : vector<16x32xf32>
    %cst_41 = arith.constant dense<0.000000e+00> : vector<16xf32>
    %234 = vector.multi_reduction <add>, %233, %cst_41 [1] : vector<16x32xf32> to vector<16xf32>
    %235 = vector.shape_cast %234 : vector<16xf32> to vector<16x1xf32>
    %cst_42 = arith.constant 3.200000e+01 : f32
    %236 = vector.broadcast %cst_42 : f32 to vector<16x1xf32>
    %237 = arith.divf %235, %236 : vector<16x1xf32>
    %238 = vector.broadcast %230 : vector<16x1xf32> to vector<16x32xf32>
    %239 = arith.subf %226, %238 : vector<16x32xf32>
    %cst_43 = arith.constant 9.99999974E-6 : f32
    %240 = vector.broadcast %cst_43 : f32 to vector<16x1xf32>
    %241 = arith.addf %237, %240 : vector<16x1xf32>
    %242 = math.rsqrt %241 : vector<16x1xf32>
    %243 = vector.broadcast %242 : vector<16x1xf32> to vector<16x32xf32>
    %244 = arith.mulf %239, %243 : vector<16x32xf32>
    %245 = vector.broadcast %136 : vector<1x32xf32> to vector<16x32xf32>
    %246 = arith.mulf %244, %245 : vector<16x32xf32>
    %247 = vector.broadcast %137 : vector<1x32xf32> to vector<16x32xf32>
    %248 = arith.addf %246, %247 : vector<16x32xf32>
    %249 = vector.shape_cast %203 : vector<8x8x8xf32> to vector<2x4x8x8xf32>
    %250 = vector.extract_strided_slice %249 {offsets = [0, 0, 0, 0], sizes = [2, 1, 8, 8], strides = [1, 1, 1, 1]} : vector<2x4x8x8xf32> to vector<2x1x8x8xf32>
    %251 = vector.shape_cast %250 : vector<2x1x8x8xf32> to vector<2x8x8xf32>
    %252 = vector.shape_cast %251 : vector<2x8x8xf32> to vector<16x8xf32>
    %253 = vector.extract_strided_slice %249 {offsets = [0, 1, 0, 0], sizes = [2, 1, 8, 8], strides = [1, 1, 1, 1]} : vector<2x4x8x8xf32> to vector<2x1x8x8xf32>
    %254 = vector.shape_cast %253 : vector<2x1x8x8xf32> to vector<2x8x8xf32>
    %255 = vector.shape_cast %254 : vector<2x8x8xf32> to vector<16x8xf32>
    %256 = vector.extract_strided_slice %249 {offsets = [0, 2, 0, 0], sizes = [2, 1, 8, 8], strides = [1, 1, 1, 1]} : vector<2x4x8x8xf32> to vector<2x1x8x8xf32>
    %257 = vector.shape_cast %256 : vector<2x1x8x8xf32> to vector<2x8x8xf32>
    %258 = vector.shape_cast %257 : vector<2x8x8xf32> to vector<16x8xf32>
    %259 = vector.extract_strided_slice %249 {offsets = [0, 3, 0, 0], sizes = [2, 1, 8, 8], strides = [1, 1, 1, 1]} : vector<2x4x8x8xf32> to vector<2x1x8x8xf32>
    %260 = vector.shape_cast %259 : vector<2x1x8x8xf32> to vector<2x8x8xf32>
    %261 = vector.shape_cast %260 : vector<2x8x8xf32> to vector<16x8xf32>
    %262 = tpu.concatenate %252, %255, %258, %261 in 1 : vector<16x8xf32>, vector<16x8xf32>, vector<16x8xf32>, vector<16x8xf32> -> vector<16x32xf32>
    %c0_44 = arith.constant 0 : index
    %c0_45 = arith.constant 0 : index
    %263 = vector.load %arg7[%c0_44, %c0_45] : memref<32x64xf32, #tpu.memory_space<vmem>>, vector<32x64xf32>
    %c0_46 = arith.constant 0 : index
    %c0_47 = arith.constant 0 : index
    %264 = vector.load %arg8[%c0_46, %c0_47] : memref<64x32xf32, #tpu.memory_space<vmem>>, vector<64x32xf32>
    %c0_48 = arith.constant 0 : index
    %c0_49 = arith.constant 0 : index
    %265 = vector.load %arg9[%c0_48, %c0_49] : memref<2x96xf32, #tpu.memory_space<vmem>>, vector<2x96xf32>
    %266 = vector.extract_strided_slice %265 {offsets = [0, 0], sizes = [1, 64], strides = [1, 1]} : vector<2x96xf32> to vector<1x64xf32>
    %267 = vector.extract_strided_slice %265 {offsets = [0, 64], sizes = [1, 32], strides = [1, 1]} : vector<2x96xf32> to vector<1x32xf32>
    %268 = vector.extract_strided_slice %265 {offsets = [1, 0], sizes = [1, 32], strides = [1, 1]} : vector<2x96xf32> to vector<1x32xf32>
    %269 = vector.extract_strided_slice %265 {offsets = [1, 32], sizes = [1, 32], strides = [1, 1]} : vector<2x96xf32> to vector<1x32xf32>
    %270 = arith.truncf %248 : vector<16x32xf32> to vector<16x32xbf16>
    %271 = arith.truncf %263 : vector<32x64xf32> to vector<32x64xbf16>
    %cst_50 = arith.constant dense<0.000000e+00> : vector<16x64xf32>
    %272 = tpu.matmul %270, %271, %cst_50 {dimension_numbers = #tpu.dot_dimension_numbers<[1], [0], [0], [1], [0, 0, 1, 1], [], []>} : vector<16x32xbf16>, vector<32x64xbf16>, vector<16x64xf32> -> vector<16x64xf32>
    %273 = vector.broadcast %266 : vector<1x64xf32> to vector<16x64xf32>
    %274 = arith.addf %272, %273 : vector<16x64xf32>
    %cst_51 = arith.constant 0.000000e+00 : f32
    %275 = vector.broadcast %cst_51 : f32 to vector<16x64xf32>
    %276 = arith.maximumf %274, %275 : vector<16x64xf32>
    %277 = arith.truncf %276 : vector<16x64xf32> to vector<16x64xbf16>
    %278 = arith.truncf %264 : vector<64x32xf32> to vector<64x32xbf16>
    %cst_52 = arith.constant dense<0.000000e+00> : vector<16x32xf32>
    %279 = tpu.matmul %277, %278, %cst_52 {dimension_numbers = #tpu.dot_dimension_numbers<[1], [0], [0], [1], [0, 0, 1, 1], [], []>} : vector<16x64xbf16>, vector<64x32xbf16>, vector<16x32xf32> -> vector<16x32xf32>
    %280 = vector.broadcast %267 : vector<1x32xf32> to vector<16x32xf32>
    %281 = arith.addf %279, %280 : vector<16x32xf32>
    %282 = arith.addf %281, %248 : vector<16x32xf32>
    %cst_53 = arith.constant dense<0.000000e+00> : vector<16xf32>
    %283 = vector.multi_reduction <add>, %282, %cst_53 [1] : vector<16x32xf32> to vector<16xf32>
    %284 = vector.shape_cast %283 : vector<16xf32> to vector<16x1xf32>
    %cst_54 = arith.constant 3.200000e+01 : f32
    %285 = vector.broadcast %cst_54 : f32 to vector<16x1xf32>
    %286 = arith.divf %284, %285 : vector<16x1xf32>
    %287 = vector.broadcast %286 : vector<16x1xf32> to vector<16x32xf32>
    %288 = arith.subf %282, %287 : vector<16x32xf32>
    %289 = arith.mulf %288, %288 : vector<16x32xf32>
    %cst_55 = arith.constant dense<0.000000e+00> : vector<16xf32>
    %290 = vector.multi_reduction <add>, %289, %cst_55 [1] : vector<16x32xf32> to vector<16xf32>
    %291 = vector.shape_cast %290 : vector<16xf32> to vector<16x1xf32>
    %cst_56 = arith.constant 3.200000e+01 : f32
    %292 = vector.broadcast %cst_56 : f32 to vector<16x1xf32>
    %293 = arith.divf %291, %292 : vector<16x1xf32>
    %294 = vector.broadcast %286 : vector<16x1xf32> to vector<16x32xf32>
    %295 = arith.subf %282, %294 : vector<16x32xf32>
    %cst_57 = arith.constant 9.99999974E-6 : f32
    %296 = vector.broadcast %cst_57 : f32 to vector<16x1xf32>
    %297 = arith.addf %293, %296 : vector<16x1xf32>
    %298 = math.rsqrt %297 : vector<16x1xf32>
    %299 = vector.broadcast %298 : vector<16x1xf32> to vector<16x32xf32>
    %300 = arith.mulf %295, %299 : vector<16x32xf32>
    %301 = vector.broadcast %268 : vector<1x32xf32> to vector<16x32xf32>
    %302 = arith.mulf %300, %301 : vector<16x32xf32>
    %303 = vector.broadcast %269 : vector<1x32xf32> to vector<16x32xf32>
    %304 = arith.addf %302, %303 : vector<16x32xf32>
    %305 = tpu.concatenate %304, %128, %262 in 1 : vector<16x32xf32>, vector<16x32xf32>, vector<16x32xf32> -> vector<16x96xf32>
    %c0_58 = arith.constant 0 : index
    %c0_59 = arith.constant 0 : index
    %306 = vector.load %arg10[%c0_58, %c0_59] : memref<16x96xf32, #tpu.memory_space<vmem>>, vector<16x96xf32>
    tpu.vector_store %arg10[%c0_58, %c0_59], %305 {strides = array<i32>} : memref<16x96xf32, #tpu.memory_space<vmem>>, vector<16x96xf32>,
    return
  }
  func.func @transform_0(%arg0: i32) -> (i32, i32) {
    %c0_i32 = arith.constant 0 : i32
    %c0_i32_0 = arith.constant 0 : i32
    %c0_i32_1 = arith.constant 0 : i32
    return %c0_i32, %c0_i32_0 : i32, i32
  }
  func.func @transform_1(%arg0: i32) -> (i32, i32) {
    %c0_i32 = arith.constant 0 : i32
    %c0_i32_0 = arith.constant 0 : i32
    %c0_i32_1 = arith.constant 0 : i32
    return %c0_i32, %c0_i32_0 : i32, i32
  }
  func.func @transform_2(%arg0: i32) -> (i32, i32, i32) {
    %c0_i32 = arith.constant 0 : i32
    %c0_i32_0 = arith.constant 0 : i32
    %c0_i32_1 = arith.constant 0 : i32
    %c0_i32_2 = arith.constant 0 : i32
    return %c0_i32, %c0_i32_0, %c0_i32_1 : i32, i32, i32
  }
  func.func @transform_3(%arg0: i32) -> (i32, i32, i32) {
    %c0_i32 = arith.constant 0 : i32
    %c0_i32_0 = arith.constant 0 : i32
    %c0_i32_1 = arith.constant 0 : i32
    %c0_i32_2 = arith.constant 0 : i32
    return %c0_i32, %c0_i32_0, %c0_i32_1 : i32, i32, i32
  }
  func.func @transform_4(%arg0: i32) -> (i32, i32, i32) {
    %c0_i32 = arith.constant 0 : i32
    %c0_i32_0 = arith.constant 0 : i32
    %c0_i32_1 = arith.constant 0 : i32
    %c0_i32_2 = arith.constant 0 : i32
    return %c0_i32, %c0_i32_0, %c0_i32_1 : i32, i32, i32
  }
  func.func @transform_5(%arg0: i32) -> (i32, i32, i32) {
    %c0_i32 = arith.constant 0 : i32
    %c0_i32_0 = arith.constant 0 : i32
    %c0_i32_1 = arith.constant 0 : i32
    %c0_i32_2 = arith.constant 0 : i32
    return %c0_i32, %c0_i32_0, %c0_i32_1 : i32, i32, i32
  }
  func.func @transform_6(%arg0: i32) -> (i32, i32) {
    %c0_i32 = arith.constant 0 : i32
    %c0_i32_0 = arith.constant 0 : i32
    %c0_i32_1 = arith.constant 0 : i32
    return %c0_i32, %c0_i32_0 : i32, i32
  }
  func.func @transform_7(%arg0: i32) -> (i32, i32) {
    %c0_i32 = arith.constant 0 : i32
    %c0_i32_0 = arith.constant 0 : i32
    %c0_i32_1 = arith.constant 0 : i32
    return %c0_i32, %c0_i32_0 : i32, i32
  }
  func.func @transform_8(%arg0: i32) -> (i32, i32) {
    %c0_i32 = arith.constant 0 : i32
    %c0_i32_0 = arith.constant 0 : i32
    %c0_i32_1 = arith.constant 0 : i32
    return %c0_i32, %c0_i32_0 : i32, i32
  }
  func.func @transform_9(%arg0: i32) -> (i32, i32) {
    %c0_i32 = arith.constant 0 : i32
    %c0_i32_0 = arith.constant 0 : i32
    %c0_i32_1 = arith.constant 0 : i32
    return %c0_i32, %c0_i32_0 : i32, i32
  }
}

</mosaic_0001>

<bundles_post_ra>
// kernel: decoder_layer_pallas.1
= control target key start
LH: loop header
LB: loop body
LE: loop exit
PB: predicated region body
PF: predicated region fallthrough
CT: control target
= control target key end

     0   :  { %v3059_v0 = vmov 0.0   ;;  %vm3060_vm0 = vmmov 0   ;;  %vm51_vm1 = vcmask 261120   ;;  %v47_v10 = vlaneseq  ;;  %s3061_s22 = smov 104   ;;  %s3062_s23 = smov 120   ;;  %s3869_s4 = inlined_call_operand.vmem [shape: f32[2,32,128], index: 4, kind: input, shape index: {}]   ;;  %s3870_s0 = inlined_call_operand.vmem [shape: f32[16,32], index: 0, kind: input, shape index: {}]   ;;  %s3871_s5 = inlined_call_operand.vmem [shape: f32[2,2,96], index: 5, kind: input, shape index: {}]   ;;  %s3872_s2 = inlined_call_operand.vmem [shape: f32[2,8,8], index: 2, kind: input, shape index: {}]   ;;  %s3873_s1 = inlined_call_operand.vmem [shape: f32[16,32], index: 1, kind: input, shape index: {}]   ;;  %s3874_s3 = inlined_call_operand.vmem [shape: f32[2,8,8], index: 3, kind: input, shape index: {}]   ;;  %s3875_s6 = inlined_call_operand.vmem [shape: f32[32,64], index: 6, kind: input, shape index: {}]   ;;  %s3876_s7 = inlined_call_operand.vmem [shape: f32[64,32], index: 7, kind: input, shape index: {}]   ;;  %s3877_s8 = inlined_call_operand.vmem [shape: f32[2,96], index: 8, kind: input, shape index: {}]   ;;  %s3878_s9 = inlined_call_operand.vmem [shape: f32[16,96], index: 9, kind: output, shape index: {}]  }
   0x1   :  { %2690 = vmatprep.subr.bf16.mxu1 %v3059_v0  ;;  %v41_v1 = vld [vmem:[%s3869_s4 + $0x10] sm:$0xff]  ;;  %v42_v2 = vld [vmem:[%s3869_s4 + $0x18] sm:$0xff]  ;;  %v39_v3 = vld [vmem:[%s3869_s4] sm:$0xff]  ;;  %2694 = vmatprep.mubr.msk.bf16.mxu1 %vm3060_vm0, %v3059_v0  ;;  %s3063_s24 = smov 112   ;;  %s3064_s25 = smov 96   ;;  %vm127_vm2 = vcmask 64512  }
   0x2   :  { %v3132_v4 = vpack.c.bf16 %v42_v2, %v41_v1  ;;  %v40_v5 = vld [vmem:[%s3869_s4 + $0x8] sm:$0xff]  ;;  %2704 = vmatprep.subr.bf16.mxu0 %v3059_v0  ;;  %2706 = vmatprep.mubr.msk.bf16.mxu0 %vm3060_vm0, %v3059_v0  ;;  %v3146_v7 = vld [vmem:[%s3870_s0] sm:$0xff]  ;;  %v3161_v11 = vshrl.u32 %v47_v10, 7  ;;  %s3065_s26 = smov 64   ;;  %vm634_vm3 = vcmask 1043456   ;;  %s3067_s10 = smov 8  }
   0x3   :  { %v3141_v6 = vpack.c.bf16 %v40_v5, %v39_v3  ;;  %v3151_v8 = vld [vmem:[%s3870_s0 + $0x8] sm:$0xff]  ;;  %v3169_v13 = vld [vmem:[%s3871_s5] sm:$0x3]  ;;  %s3068_s11 = smov 16   ;;  %s3069_s12 = smov 24   ;;  %vm1040_vm4 = vcmask 130048  }
   0x4   :  { %2691 = vmatpush3.bf16.msra.mxu1 %v3132_v4  ;;  %v44_v9 = vpack.c.bf16 %v3151_v8, %v3146_v7  ;;  %v3164_v12 = vsub.s32 0, %v3161_v11  ;;  %v37_v54 = vld [vmem:[%s3872_s2] sm:$0xff]  ;;  %vm1043_vm5 = vcmask 195584   ;;  %vm2447_vm6 = vcmask 523264  }
   0x5   :  { %2692 = vmatprep.subr.bf16.mxu1 %v3059_v0  ;;  %vm2552_vm7 = vcmask 785408  }
   0x6   :  { %v50_v14 = vrot.slane %v3169_v13, %v3164_v12 }
   0x8   :  { %2693 = vmatpush3.bf16.msra.mxu1 %v3141_v6 }
   0x9   :  { %2698 = vmatprep.subr.bf16.mxu1 %v3059_v0 }
   0xb   :  { %2695 = vmatmul.mubr.msk.bf16.vlgmr.msra.gmra.mxu1 %vm51_vm1, %v44_v9 }
   0xc   :  { %2700 = vmatprep.mubr.msk.bf16.mxu1 %vm3060_vm0, %v3059_v0 }
  0xcb   :  { %v89_v15 = vpop.f32.mrf.mxu1 }
  0xcc   :  { %v90_v16 = vadd.f32 %v89_v15, %v50_v14 }
  0xcd   :  { %v2696_v17 = vpop.f32.mrf.mxu1 }
  0xce   :  { %110 = vrot.lane.b32.xlu1 %v90_v16, %s3061_s22  ;;  %98 = vrot.lane.b32.xlu0 %v90_v16, %s3062_s23  ;;  %v116_v21 = vpack.c.bf16 %v90_v16, %v90_v16 }
  0xcf   :  { %v92_v18 = vpop.f32.mrf.mxu1 }
  0xd0   :  { %v93_v19 = vadd.f32 %v92_v18, %v50_v14 }
  0xd1   :  { %v2697_v20 = vpop.f32.mrf.mxu1 }
  0xd2   :  { %104 = vrot.lane.b32.xlu0 %v90_v16, %s3063_s24  ;;  %100 = vrot.lane.b32.xlu1 %v93_v19, %s3062_s23  ;;  %v3194_v31 = vpack.c.bf16 %v93_v19, %v93_v19 }
  0xd6   :  { %106 = vrot.lane.b32.xlu0 %v93_v19, %s3063_s24  ;;  %112 = vrot.lane.b32.xlu1 %v93_v19, %s3061_s22 }
  0xda   :  { %125 = vrot.lane.b32.xlu0 %v116_v21, %s3064_s25 }
 0x140   :  { %v111_v22 = vpop.permute.xlu1 %110  ;;  %v99_v23 = vpop.permute.xlu0 %98 }
 0x141   :  { %v3180_v24 = vpack.c.bf16 %v99_v23, %v99_v23  ;;  %v3184_v27 = vpack.c.bf16 %v111_v22, %v111_v22 }
 0x143   :  { %175 = vrot.lane.b32.xlu1 %v3180_v24, %s3064_s25 }
 0x144   :  { %v105_v25 = vpop.permute.xlu0 %104  ;;  %v101_v26 = vpop.permute.xlu1 %100 }
 0x145   :  { %v3186_v28 = vpack.c.bf16 %v105_v25, %v105_v25  ;;  %v3192_v30 = vpack.c.bf16 %v101_v26, %v101_v26  ;;  %v38_v26 = vld [vmem:[%s3872_s2 + $0x8] sm:$0xff]  ;;  %s3066_s2 = smov 32  }
 0x147   :  { %224 = vrot.lane.b32.xlu0 %v3186_v28, %s3064_s25  ;;  %273 = vrot.lane.b32.xlu1 %v3184_v27, %s3064_s25 }
 0x148   :  { %v107_v29 = vpop.permute.xlu0 %106  ;;  %v113_v32 = vpop.permute.xlu1 %112 }
 0x149   :  { %v3200_v34 = vpack.c.bf16 %v107_v29, %v107_v29  ;;  %v3202_v35 = vpack.c.bf16 %v113_v32, %v113_v32 }
 0x14b   :  { %371 = vrot.lane.b32.xlu1 %v3192_v30, %s3064_s25  ;;  %322 = vrot.lane.b32.xlu0 %v3194_v31, %s3064_s25 }
 0x14c   :  { %v126_v33 = vpop.permute.xlu0 %125 }
 0x14d   :  { %v132_v36 = vsel %vm127_vm2, %v126_v33, 0 }
 0x14e   :  { %2699 = vmatpush3.bf16.xpose.msra.mxu1 %v132_v36 }
 0x14f   :  { %469 = vrot.lane.b32.xlu1 %v3202_v35, %s3064_s25  ;;  %420 = vrot.lane.b32.xlu0 %v3200_v34, %s3064_s25 }
 0x150   :  { %2710 = vmatprep.subr.bf16.mxu1 %v3059_v0 }
 0x153   :  { %629 = vrot.lane.b32.xlu1 %v116_v21, %s3065_s26 }
 0x155   :  { %2701 = vmatmul.mubr.msk.bf16.vlgmr.msra.gmra.mxu1 %vm127_vm2, %v116_v21 }
 0x156   :  { %2712 = vmatprep.mubr.msk.bf16.mxu1 %vm3060_vm0, %v3059_v0 }
 0x1b5   :  { %v176_v37 = vpop.permute.xlu1 %175 }
 0x1b6   :  { %v181_v38 = vsel %vm127_vm2, %v176_v37, 0 }
 0x1b7   :  { %2705 = vmatpush3.bf16.xpose.msra.mxu0 %v181_v38 }
 0x1b8   :  { %2716 = vmatprep.subr.bf16.mxu0 %v3059_v0 }
 0x1b9   :  { %v225_v39 = vpop.permute.xlu0 %224  ;;  %v274_v41 = vpop.permute.xlu1 %273 }
 0x1ba   :  { %v230_v40 = vsel %vm127_vm2, %v225_v39, 0  ;;  %v279_v42 = vsel %vm127_vm2, %v274_v41, 0 }
 0x1bb   :  { %2711 = vmatpush3.bf16.xpose.msra.mxu1 %v230_v40 }
 0x1bc   :  { %2722 = vmatprep.subr.bf16.mxu1 %v3059_v0 }
 0x1bd   :  { %v323_v43 = vpop.permute.xlu0 %322  ;;  %v372_v45 = vpop.permute.xlu1 %371 }
 0x1be   :  { %2707 = vmatmul.mubr.msk.bf16.vlgmr.msra.gmra.mxu0 %vm127_vm2, %v3180_v24  ;;  %v328_v44 = vsel %vm127_vm2, %v323_v43, 0  ;;  %v377_v46 = vsel %vm127_vm2, %v372_v45, 0 }
 0x1bf   :  { %2717 = vmatpush3.bf16.xpose.msra.mxu0 %v279_v42  ;;  %2718 = vmatprep.mubr.msk.bf16.mxu0 %vm3060_vm0, %v3059_v0 }
 0x1c0   :  { %2728 = vmatprep.subr.bf16.mxu0 %v3059_v0 }
 0x1c1   :  { %v421_v47 = vpop.permute.xlu0 %420  ;;  %v470_v48 = vpop.permute.xlu1 %469 }
 0x1c2   :  { %2713 = vmatmul.mubr.msk.bf16.vlgmr.msra.gmra.mxu1 %vm127_vm2, %v3186_v28  ;;  %v426_v49 = vsel %vm127_vm2, %v421_v47, 0  ;;  %v475_v50 = vsel %vm127_vm2, %v470_v48, 0 }
 0x1c3   :  { %2723 = vmatpush3.bf16.xpose.msra.mxu1 %v328_v44  ;;  %2724 = vmatprep.mubr.msk.bf16.mxu1 %vm3060_vm0, %v3059_v0 }
 0x1c4   :  { %2734 = vmatprep.subr.bf16.mxu1 %v3059_v0 }
 0x1c5   :  { %v630_v51 = vpop.permute.xlu1 %629 }
 0x1c6   :  { %2719 = vmatmul.mubr.msk.bf16.vlgmr.msra.gmra.mxu0 %vm127_vm2, %v3184_v27  ;;  %v636_v52 = vsel %vm634_vm3, %v630_v51, 0 }
 0x1c7   :  { %2729 = vmatpush3.bf16.xpose.msra.mxu0 %v377_v46  ;;  %2730 = vmatprep.mubr.msk.bf16.mxu0 %vm3060_vm0, %v3059_v0 }
 0x1c8   :  { %2740 = vmatprep.subr.bf16.mxu0 %v3059_v0 }
 0x1ca   :  { %2725 = vmatmul.mubr.msk.bf16.vlgmr.msra.gmra.mxu1 %vm127_vm2, %v3194_v31 }
 0x1cb   :  { %2735 = vmatpush3.bf16.xpose.msra.mxu1 %v426_v49  ;;  %2736 = vmatprep.mubr.msk.bf16.mxu1 %vm3060_vm0, %v3059_v0 }
 0x1cc   :  { %2746 = vmatprep.subr.bf16.mxu1 %v3059_v0 }
 0x1ce   :  { %2731 = vmatmul.mubr.msk.bf16.vlgmr.msra.gmra.mxu0 %vm127_vm2, %v3192_v30 }
 0x1cf   :  { %2741 = vmatpush3.bf16.xpose.msra.mxu0 %v475_v50  ;;  %2742 = vmatprep.mubr.msk.bf16.mxu0 %vm3060_vm0, %v3059_v0 }
 0x1d0   :  { %2752 = vmatprep.subr.bf16.mxu0 %v3059_v0 }
 0x1d2   :  { %2737 = vmatmul.mubr.msk.bf16.vlgmr.msra.gmra.mxu1 %vm127_vm2, %v3200_v34 }
 0x1d3   :  { %2747 = vmatpush3.bf16.msra.mxu1 %v636_v52  ;;  %2748 = vmatprep.mubr.msk.bf16.mxu1 %vm3060_vm0, %v3059_v0 }
 0x1d4   :  { %2758 = vmatprep.subr.bf16.mxu1 %v3059_v0 }
 0x1d6   :  { %2743 = vmatmul.mubr.msk.bf16.vlgmr.msra.gmra.mxu0 %vm127_vm2, %v3202_v35 }
 0x1d7   :  { %2754 = vmatprep.mubr.msk.bf16.mxu0 %vm3060_vm0, %v3059_v0 }
 0x215   :  { %v168_v53 = vpop.f32.mrf.mxu1 }
 0x216   :  { %v517_v55 = vmul.f32 0.35355338, %v168_v53 }
 0x217   :  { %v2702_v56 = vpop.f32.mrf.mxu1 }
 0x218   :  { %v3261_v57 = vadd.f32 %v517_v55, %v37_v54 }
 0x219   :  { %v171_v58 = vpop.f32.mrf.mxu1 }
 0x21a   :  { %v533_v59 = vsel %vm127_vm2, %v3261_v57, -inf }
 0x21b   :  { %534 = vmax.xlane.f32.xlu0 %v533_v59  ;;  %v2703_v60 = vpop.f32.mrf.mxu1 }
 0x27e   :  { %v217_v61 = vpop.f32.mrf.mxu0 }
 0x27f   :  { %v518_v62 = vmul.f32 0.35355338, %v217_v61 }
 0x280   :  { %v2708_v63 = vpop.f32.mrf.mxu0 }
 0x281   :  { %v3265_v1 = vadd.f32 %v518_v62, %v37_v54 }
 0x282   :  { %v220_v2 = vpop.f32.mrf.mxu0  ;;  %v266_v3 = vpop.f32.mrf.mxu1 }
 0x283   :  { %v519_v5 = vmul.f32 0.35355338, %v266_v3  ;;  %v536_v9 = vsel %vm127_vm2, %v3265_v1, -inf }
 0x284   :  { %537 = vmax.xlane.f32.xlu1 %v536_v9  ;;  %v2709_v10 = vpop.f32.mrf.mxu0  ;;  %v2714_v14 = vpop.f32.mrf.mxu1 }
 0x285   :  { %v527_v15 = vadd.f32 %v519_v5, %v37_v54 }
 0x286   :  { %v269_v16 = vpop.f32.mrf.mxu1  ;;  %v315_v17 = vpop.f32.mrf.mxu0 }
 0x287   :  { %v520_v18 = vmul.f32 0.35355338, %v315_v17  ;;  %v539_v19 = vsel %vm127_vm2, %v527_v15, -inf }
 0x288   :  { %v2720_v20 = vpop.f32.mrf.mxu0  ;;  %540 = vmax.xlane.f32.xlu0 %v539_v19  ;;  %v2715_v21 = vpop.f32.mrf.mxu1 }
 0x289   :  { %v528_v22 = vadd.f32 %v520_v18, %v37_v54 }
 0x28a   :  { %v318_v23 = vpop.f32.mrf.mxu0  ;;  %v364_v25 = vpop.f32.mrf.mxu1 }
 0x28b   :  { %v521_v29 = vmul.f32 0.35355338, %v364_v25  ;;  %v542_v32 = vsel %vm127_vm2, %v528_v22, -inf }
 0x28c   :  { %v2721_v33 = vpop.f32.mrf.mxu0  ;;  %543 = vmax.xlane.f32.xlu0 %v542_v32  ;;  %v2726_v36 = vpop.f32.mrf.mxu1 }
 0x28d   :  { %v3274_v37 = vadd.f32 %v521_v29, %v38_v26 }
 0x28e   :  { %v367_v38 = vpop.f32.mrf.mxu1  ;;  %v413_v39 = vpop.f32.mrf.mxu0 }
 0x28f   :  { %v522_v40 = vmul.f32 0.35355338, %v413_v39  ;;  %v545_v41 = vsel %vm127_vm2, %v3274_v37, -inf }
 0x290   :  { %v2732_v42 = vpop.f32.mrf.mxu0  ;;  %546 = vmax.xlane.f32.xlu1 %v545_v41  ;;  %v2727_v43 = vpop.f32.mrf.mxu1 }
 0x291   :  { %v3278_v44 = vadd.f32 %v522_v40, %v38_v26 }
 0x292   :  { %v416_v45 = vpop.f32.mrf.mxu0  ;;  %v462_v46 = vpop.f32.mrf.mxu1 }
 0x293   :  { %v523_v47 = vmul.f32 0.35355338, %v462_v46  ;;  %v548_v48 = vsel %vm127_vm2, %v3278_v44, -inf }
 0x294   :  { %v2733_v49 = vpop.f32.mrf.mxu0  ;;  %549 = vmax.xlane.f32.xlu0 %v548_v48  ;;  %v2738_v50 = vpop.f32.mrf.mxu1 }
 0x295   :  { %v531_v51 = vadd.f32 %v523_v47, %v38_v26 }
 0x296   :  { %v465_v52 = vpop.f32.mrf.mxu1  ;;  %v511_v53 = vpop.f32.mrf.mxu0 }
 0x297   :  { %v524_v54 = vmul.f32 0.35355338, %v511_v53  ;;  %v551_v55 = vsel %vm127_vm2, %v531_v51, -inf }
 0x298   :  { %v2744_v56 = vpop.f32.mrf.mxu0  ;;  %552 = vmax.xlane.f32.xlu1 %v551_v55  ;;  %v2739_v58 = vpop.f32.mrf.mxu1 }
 0x299   :  { %v532_v59 = vadd.f32 %v524_v54, %v38_v26 }
 0x29a   :  { %v514_v60 = vpop.f32.mrf.mxu0 }
 0x29b   :  { %v554_v61 = vsel %vm127_vm2, %v532_v59, -inf }
 0x29c   :  { %v2745_v62 = vpop.f32.mrf.mxu0  ;;  %555 = vmax.xlane.f32.xlu0 %v554_v61 }
 0x2a4   :  { %v535_v63 = vpop.xlane.xlu0 %534 }
 0x2a5   :  { %v557_v2 = vsub.f32 %v3261_v57, %v535_v63 }
 0x2a7   :  { %v565_v3 = vmul.f32 1.442695, %v557_v2 }
 0x2a9   :  { %726 = vrot.lane.b32.xlu1 %v3186_v28, %s3065_s26  ;;  %2983 = vpow2.f32 %v565_v3 }
 0x2ad   :  { %774 = vrot.lane.b32.xlu1 %v3184_v27, %s3065_s26 }
 0x2b2   :  { %678 = vrot.lane.b32.xlu0 %v3180_v24, %s3065_s26 }
 0x2b6   :  { %v3291_v5 = vpop.eup %2983 }
 0x2b7   :  { %v581_v9 = vsel %vm127_vm2, %v3291_v5, 0.0 }
 0x2d1   :  { %582 = vadd.xlane.f32.xlu1 %v581_v9 }
 0x30d   :  { %v538_v10 = vpop.xlane.xlu1 %537 }
 0x30e   :  { %v558_v28 = vsub.f32 %v3265_v1, %v538_v10 }
 0x310   :  { %v567_v14 = vmul.f32 1.442695, %v558_v28 }
 0x311   :  { %v541_v16 = vpop.xlane.xlu0 %540 }
 0x312   :  { %2985 = vpow2.f32 %v567_v14  ;;  %v559_v27 = vsub.f32 %v527_v15, %v541_v16 }
 0x314   :  { %v569_v17 = vmul.f32 1.442695, %v559_v27 }
 0x315   :  { %v544_v24 = vpop.xlane.xlu0 %543 }
 0x316   :  { %2987 = vpow2.f32 %v569_v17  ;;  %v560_v18 = vsub.f32 %v528_v22, %v544_v24 }
 0x318   :  { %v571_v57 = vmul.f32 1.442695, %v560_v18 }
 0x319   :  { %v547_v32 = vpop.xlane.xlu1 %546 }
 0x31a   :  { %2989 = vpow2.f32 %v571_v57  ;;  %v561_v33 = vsub.f32 %v3274_v37, %v547_v32 }
 0x31c   :  { %v573_v39 = vmul.f32 1.442695, %v561_v33 }
 0x31d   :  { %v550_v21 = vpop.xlane.xlu0 %549 }
 0x31e   :  { %v562_v38 = vsub.f32 %v3278_v44, %v550_v21  ;;  %2991 = vpow2.f32 %v573_v39 }
 0x31f   :  { %v3296_v19 = vpop.eup %2985 }
 0x320   :  { %v584_v20 = vsel %vm127_vm2, %v3296_v19, 0.0  ;;  %v575_v41 = vmul.f32 1.442695, %v562_v38 }
 0x321   :  { %585 = vadd.xlane.f32.xlu0 %v584_v20  ;;  %v553_v36 = vpop.xlane.xlu1 %552 }
 0x322   :  { %v563_v40 = vsub.f32 %v531_v51, %v553_v36  ;;  %2993 = vpow2.f32 %v575_v41 }
 0x323   :  { %v3300_v23 = vpop.eup %2987 }
 0x324   :  { %v587_v1 = vsel %vm127_vm2, %v3300_v23, 0.0  ;;  %v577_v42 = vmul.f32 1.442695, %v563_v40 }
 0x325   :  { %v556_v25 = vpop.xlane.xlu0 %555  ;;  %588 = vadd.xlane.f32.xlu1 %v587_v1  ;;  %v727_v46 = vpop.permute.xlu1 %726 }
 0x326   :  { %v564_v43 = vsub.f32 %v532_v59, %v556_v25  ;;  %2995 = vpow2.f32 %v577_v42  ;;  %v732_v56 = vsel %vm634_vm3, %v727_v46, 0 }
 0x327   :  { %v3304_v15 = vpop.eup %2989 }
 0x328   :  { %v590_v22 = vsel %vm127_vm2, %v3304_v15, 0.0  ;;  %v579_v45 = vmul.f32 1.442695, %v564_v43 }
 0x329   :  { %591 = vadd.xlane.f32.xlu0 %v590_v22  ;;  %v679_v26 = vpop.permute.xlu0 %678  ;;  %v775_v47 = vpop.permute.xlu1 %774 }
 0x32a   :  { %v684_v29 = vsel %vm634_vm3, %v679_v26, 0  ;;  %2997 = vpow2.f32 %v579_v45 }
 0x32b   :  { %2753 = vmatpush3.bf16.msra.mxu0 %v684_v29 }
 0x32c   :  { %2764 = vmatprep.subr.bf16.mxu0 %v3059_v0 }
 0x336   :  { %870 = vrot.lane.b32.xlu1 %v3192_v30, %s3065_s26  ;;  %v3316_v30 = vpop.eup %2991 }
 0x337   :  { %v593_v37 = vsel %vm127_vm2, %v3316_v30, 0.0 }
 0x33f   :  { %822 = vrot.lane.b32.xlu0 %v3194_v31, %s3065_s26  ;;  %v3318_v31 = vpop.eup %2993 }
 0x340   :  { %v3322_v44 = vpop.eup %2995  ;;  %v596_v49 = vsel %vm127_vm2, %v3318_v31, 0.0 }
 0x341   :  { %v599_v50 = vsel %vm127_vm2, %v3322_v44, 0.0  ;;  %v3328_v51 = vpop.eup %2997 }
 0x342   :  { %v602_v52 = vsel %vm127_vm2, %v3328_v51, 0.0 }
 0x35a   :  { %594 = vadd.xlane.f32.xlu1 %v593_v37  ;;  %v583_v48 = vpop.xlane.xlu1 %582 }
 0x35b   :  { %2999 = vrcp.f32 %v583_v48 }
 0x35e   :  { %597 = vadd.xlane.f32.xlu0 %v596_v49  ;;  %600 = vadd.xlane.f32.xlu1 %v599_v50 }
 0x362   :  { %603 = vadd.xlane.f32.xlu0 %v602_v52 }
 0x368   :  { %v3000_v53 = vpop.eup %2999 }
 0x369   :  { %v3333_v54 = vmul.f32 %v3000_v53, %v3291_v5 }
 0x36b   :  { %v621_v55 = vpack.c.bf16 %v3333_v54, %v3333_v54 }
 0x36d   :  { %2749 = vmatmul.mubr.msk.bf16.vlgmr.msra.gmra.mxu1 %vm127_vm2, %v621_v55 }
 0x36e   :  { %2759 = vmatpush3.bf16.msra.mxu1 %v732_v56  ;;  %2760 = vmatprep.mubr.msk.bf16.mxu1 %vm3060_vm0, %v3059_v0 }
 0x36f   :  { %966 = vrot.lane.b32.xlu1 %v3202_v35, %s3065_s26  ;;  %2770 = vmatprep.subr.bf16.mxu1 %v3059_v0  ;;  %v780_v35 = vsel %vm634_vm3, %v775_v47, 0 }
 0x378   :  { %918 = vrot.lane.b32.xlu0 %v3200_v34, %s3065_s26 }
 0x37c   :  { %1055 = vrot.lane.b32.xlu0 %v3132_v4, %s3066_s2 }
 0x3aa   :  { %v586_v58 = vpop.xlane.xlu0 %585 }
 0x3ab   :  { %3001 = vrcp.f32 %v586_v58 }
 0x3ae   :  { %v589_v59 = vpop.xlane.xlu1 %588 }
 0x3af   :  { %3003 = vrcp.f32 %v589_v59 }
 0x3b2   :  { %v592_v60 = vpop.xlane.xlu0 %591  ;;  %v871_v14 = vpop.permute.xlu1 %870 }
 0x3b3   :  { %3005 = vrcp.f32 %v592_v60  ;;  %v876_v27 = vsel %vm634_vm3, %v871_v14, 0 }
 0x3b6   :  { %v823_v3 = vpop.permute.xlu0 %822 }
 0x3b7   :  { %v828_v10 = vsel %vm634_vm3, %v823_v3, 0 }
 0x3b8   :  { %v3002_v61 = vpop.eup %3001 }
 0x3b9   :  { %v3347_v62 = vmul.f32 %v3002_v61, %v3296_v19 }
 0x3bb   :  { %v622_v63 = vpack.c.bf16 %v3347_v62, %v3347_v62 }
 0x3bc   :  { %v3004_v2 = vpop.eup %3003 }
 0x3bd   :  { %2755 = vmatmul.mubr.msk.bf16.vlgmr.msra.gmra.mxu0 %vm127_vm2, %v622_v63  ;;  %v3354_v34 = vmul.f32 %v3004_v2, %v3300_v23 }
 0x3be   :  { %2765 = vmatpush3.bf16.msra.mxu0 %v780_v35  ;;  %2766 = vmatprep.mubr.msk.bf16.mxu0 %vm3060_vm0, %v3059_v0 }
 0x3bf   :  { %v623_v5 = vpack.c.bf16 %v3354_v34, %v3354_v34  ;;  %2776 = vmatprep.subr.bf16.mxu0 %v3059_v0 }
 0x3c0   :  { %v3006_v9 = vpop.eup %3005 }
 0x3c1   :  { %2761 = vmatmul.mubr.msk.bf16.vlgmr.msra.gmra.mxu1 %vm127_vm2, %v623_v5  ;;  %v3364_v28 = vmul.f32 %v3006_v9, %v3304_v15 }
 0x3c2   :  { %2771 = vmatpush3.bf16.msra.mxu1 %v828_v10  ;;  %2772 = vmatprep.mubr.msk.bf16.mxu1 %vm3060_vm0, %v3059_v0 }
 0x3c3   :  { %v624_v16 = vpack.c.bf16 %v3364_v28, %v3364_v28  ;;  %2782 = vmatprep.subr.bf16.mxu1 %v3059_v0 }
 0x3c5   :  { %2767 = vmatmul.mubr.msk.bf16.vlgmr.msra.gmra.mxu0 %vm127_vm2, %v624_v16 }
 0x3c6   :  { %2777 = vmatpush3.bf16.msra.mxu0 %v876_v27  ;;  %2778 = vmatprep.mubr.msk.bf16.mxu0 %vm3060_vm0, %v3059_v0 }
 0x3c7   :  { %2788 = vmatprep.subr.bf16.mxu0 %v3059_v0 }
 0x3e3   :  { %v595_v17 = vpop.xlane.xlu1 %594 }
 0x3e4   :  { %3007 = vrcp.f32 %v595_v17 }
 0x3e7   :  { %v598_v24 = vpop.xlane.xlu0 %597  ;;  %v601_v18 = vpop.xlane.xlu1 %600 }
 0x3e8   :  { %3009 = vrcp.f32 %v598_v24 }
 0x3e9   :  { %3011 = vrcp.f32 %v601_v18 }
 0x3eb   :  { %v604_v57 = vpop.xlane.xlu0 %603  ;;  %v967_v26 = vpop.permute.xlu1 %966 }
 0x3ec   :  { %3013 = vrcp.f32 %v604_v57  ;;  %v972_v36 = vsel %vm634_vm3, %v967_v26, 0 }
 0x3ef   :  { %v919_v21 = vpop.permute.xlu0 %918 }
 0x3f0   :  { %v924_v15 = vsel %vm634_vm3, %v919_v21, 0 }
 0x3f1   :  { %v3008_v19 = vpop.eup %3007 }
 0x3f2   :  { %v3377_v20 = vmul.f32 %v3008_v19, %v3316_v30 }
 0x3f3   :  { %v1056_v55 = vpop.permute.xlu0 %1055 }
 0x3f4   :  { %v625_v23 = vpack.c.bf16 %v3377_v20, %v3377_v20 }
 0x3f5   :  { %v3010_v1 = vpop.eup %3009 }
 0x3f6   :  { %v3012_v25 = vpop.eup %3011  ;;  %2773 = vmatmul.mubr.msk.bf16.vlgmr.msra.gmra.mxu1 %vm127_vm2, %v625_v23  ;;  %v3384_v22 = vmul.f32 %v3010_v1, %v3318_v31 }
 0x3f7   :  { %2783 = vmatpush3.bf16.msra.mxu1 %v924_v15  ;;  %2784 = vmatprep.mubr.msk.bf16.mxu1 %vm3060_vm0, %v3059_v0  ;;  %v3391_v32 = vmul.f32 %v3012_v25, %v3322_v44 }
 0x3f8   :  { %v626_v29 = vpack.c.bf16 %v3384_v22, %v3384_v22  ;;  %2794 = vmatprep.subr.bf16.mxu1 %v3059_v0 }
 0x3f9   :  { %v3014_v33 = vpop.eup %3013  ;;  %v627_v38 = vpack.c.bf16 %v3391_v32, %v3391_v32 }
 0x3fa   :  { %2779 = vmatmul.mubr.msk.bf16.vlgmr.msra.gmra.mxu0 %vm127_vm2, %v626_v29  ;;  %v3401_v39 = vmul.f32 %v3014_v33, %v3328_v51 }
 0x3fb   :  { %2789 = vmatpush3.bf16.msra.mxu0 %v972_v36  ;;  %2790 = vmatprep.mubr.msk.bf16.mxu0 %vm3060_vm0, %v3059_v0 }
 0x3fc   :  { %2802 = vmatprep.subr.bf16.mxu0 %v3059_v0  ;;  %v628_v40 = vpack.c.bf16 %v3401_v39, %v3401_v39 }
 0x3fe   :  { %2785 = vmatmul.mubr.msk.bf16.vlgmr.msra.gmra.mxu1 %vm127_vm2, %v627_v38 }
 0x3ff   :  { %2798 = vmatprep.mubr.msk.bf16.mxu1 %vm3060_vm0, %v3059_v0  ;;  %2795 = vmatpush3.bf16.msra.mxu1 %v1056_v55 }
 0x400   :  { %2796 = vmatprep.subr.bf16.mxu1 %v3059_v0 }
 0x402   :  { %2791 = vmatmul.mubr.msk.bf16.vlgmr.msra.gmra.mxu0 %vm127_vm2, %v628_v40 }
 0x403   :  { %2806 = vmatprep.mubr.msk.bf16.mxu0 %vm3060_vm0, %v3059_v0 }
 0x42d   :  { %v672_v41 = vpop.f32.mrf.mxu1 }
 0x42f   :  { %v2750_v42 = vpop.f32.mrf.mxu1 }
 0x431   :  { %v675_v43 = vpop.f32.mrf.mxu1 }
 0x433   :  { %v2751_v45 = vpop.f32.mrf.mxu1 }
 0x47d   :  { %v720_v46 = vpop.f32.mrf.mxu0 }
 0x47f   :  { %v2756_v30 = vpop.f32.mrf.mxu0 }
 0x481   :  { %v723_v47 = vpop.f32.mrf.mxu0  ;;  %v768_v31 = vpop.f32.mrf.mxu1 }
 0x483   :  { %v2757_v37 = vpop.f32.mrf.mxu0  ;;  %v2762_v44 = vpop.f32.mrf.mxu1 }
 0x485   :  { %v771_v48 = vpop.f32.mrf.mxu1  ;;  %v816_v49 = vpop.f32.mrf.mxu0 }
 0x487   :  { %v2763_v50 = vpop.f32.mrf.mxu1  ;;  %v2768_v51 = vpop.f32.mrf.mxu0 }
 0x489   :  { %v819_v52 = vpop.f32.mrf.mxu0 }
 0x48b   :  { %v2769_v53 = vpop.f32.mrf.mxu0 }
 0x48c   :  { %v2580_v53 = vld [vmem:[%s3869_s4 + $0x38] sm:$0xff] }
 0x4b6   :  { %v864_v56 = vpop.f32.mrf.mxu1 }
 0x4b8   :  { %v2774_v58 = vpop.f32.mrf.mxu1 }
 0x4ba   :  { %v867_v59 = vpop.f32.mrf.mxu1  ;;  %v912_v4 = vpop.f32.mrf.mxu0 }
 0x4bb   :  { %v2953_v60 = vpack.i.bf16 %v912_v4, %v720_v46 }
 0x4bc   :  { %v2775_v61 = vpop.f32.mrf.mxu1  ;;  %v2780_v63 = vpop.f32.mrf.mxu0 }
 0x4bd   :  { %2954 = vrot.lane.b32.xlu1 %v2953_v60, %s3067_s10 }
 0x4be   :  { %v915_v2 = vpop.f32.mrf.mxu0  ;;  %v960_v35 = vpop.f32.mrf.mxu1 }
 0x4bf   :  { %v2958_v3 = vpack.i.bf16 %v960_v35, %v768_v31 }
 0x4c0   :  { %v2781_v5 = vpop.f32.mrf.mxu0  ;;  %v2786_v9 = vpop.f32.mrf.mxu1 }
 0x4c1   :  { %2959 = vrot.lane.b32.xlu0 %v2958_v3, %s3068_s11  ;;  %v3470_v5 = vld [vmem:[%s3871_s5 + $0x2] sm:$0x3] }
 0x4c2   :  { %v963_v10 = vpop.f32.mrf.mxu1  ;;  %v1008_v14 = vpop.f32.mrf.mxu0  ;;  %v3474_v9 = vrot.slane %v3470_v5, %v3164_v12 }
 0x4c3   :  { %v2963_v16 = vpack.i.bf16 %v1008_v14, %v816_v49 }
 0x4c4   :  { %v2787_v27 = vpop.f32.mrf.mxu1  ;;  %v2792_v17 = vpop.f32.mrf.mxu0 }
 0x4c5   :  { %2964 = vrot.lane.b32.xlu1 %v2963_v16, %s3069_s12  ;;  %1053 = vrot.lane.b32.xlu0 %v3141_v6, %s3066_s2 }
 0x4c6   :  { %v1011_v24 = vpop.f32.mrf.mxu0 }
 0x4c8   :  { %v2793_v18 = vpop.f32.mrf.mxu0 }
 0x52f   :  { %v2955_v57 = vpop.permute.xlu1 %2954 }
 0x530   :  { %v2957_v21 = vunpack.i.h.bf16 %v2955_v57  ;;  %v2956_v23 = vunpack.i.l.bf16 %v2955_v57  ;;  %v35_v57 = vld [vmem:[%s3873_s1] sm:$0xff] }
 0x532   :  { %v1038_v29 = vsel %vm127_vm2, %v672_v41, %v2956_v23  ;;  %v1039_v33 = vsel %vm127_vm2, %v864_v56, %v2957_v21  ;;  %v3431_v41 = vsub.s32 1, %v3161_v11  ;;  %v2577_v11 = vld [vmem:[%s3869_s4 + $0x20] sm:$0xff] }
 0x533   :  { %v2960_v19 = vpop.permute.xlu0 %2959 }
 0x534   :  { %v2962_v1 = vunpack.i.h.bf16 %v2960_v19  ;;  %v2961_v25 = vunpack.i.l.bf16 %v2960_v19  ;;  %v1050_v46 = vrot.slane %v3169_v13, %v3431_v41  ;;  %v2578_v13 = vld [vmem:[%s3869_s4 + $0x28] sm:$0xff] }
 0x535   :  { %v36_v19 = vld [vmem:[%s3873_s1 + $0x8] sm:$0xff] }
 0x536   :  { %v1042_v6 = vsel %vm1040_vm4, %v1039_v33, %v2962_v1  ;;  %v1041_v40 = vsel %vm1040_vm4, %v1038_v29, %v2961_v25  ;;  %v1233_v23 = vpack.c.bf16 %v36_v19, %v35_v57 }
 0x537   :  { %v2965_v15 = vpop.permute.xlu1 %2964  ;;  %v1054_v26 = vpop.permute.xlu0 %1053 }
 0x538   :  { %v2967_v36 = vunpack.i.h.bf16 %v2965_v15  ;;  %v2966_v38 = vunpack.i.l.bf16 %v2965_v15  ;;  %2797 = vmatpush3.bf16.msra.mxu1 %v1054_v26 }
 0x539   :  { %2810 = vmatprep.subr.bf16.mxu1 %v3059_v0 }
 0x53a   :  { %v1044_v42 = vsel %vm1043_vm5, %v1041_v40, %v2966_v38  ;;  %v1045_v43 = vsel %vm1043_vm5, %v1042_v6, %v2967_v36 }
 0x53b   :  { %v1046_v45 = vpack.c.bf16 %v1045_v43, %v1044_v42 }
 0x53d   :  { %2799 = vmatmul.mubr.msk.bf16.vlgmr.msra.gmra.mxu1 %vm51_vm1, %v1046_v45 }
 0x53e   :  { %2814 = vmatprep.mubr.msk.bf16.mxu1 %vm3060_vm0, %v3059_v0 }
 0x5fd   :  { %v1096_v30 = vpop.f32.mrf.mxu1 }
 0x5fe   :  { %v1097_v47 = vadd.f32 %v1096_v30, %v1050_v46 }
 0x5ff   :  { %v2800_v31 = vpop.f32.mrf.mxu1 }
 0x600   :  { %v1103_v37 = vadd.f32 %v1097_v47, %v3146_v7  ;;  %v3445_v7 = vpack.c.bf16 %v2578_v13, %v2577_v11 }
 0x601   :  { %v1099_v44 = vpop.f32.mrf.mxu1 }
 0x602   :  { %v1100_v48 = vadd.f32 %v1099_v44, %v1050_v46  ;;  %v1105_v49 = vsel %vm51_vm1, %v1103_v37, 0.0 }
 0x603   :  { %1106 = vadd.xlane.f32.xlu1 %v1105_v49  ;;  %v2801_v50 = vpop.f32.mrf.mxu1 }
 0x604   :  { %v1104_v51 = vadd.f32 %v1100_v48, %v3151_v8  ;;  %v2579_v8 = vld [vmem:[%s3869_s4 + $0x30] sm:$0xff] }
 0x605   :  { %v3455_v55 = vpack.c.bf16 %v2580_v53, %v2579_v8 }
 0x606   :  { %v1108_v52 = vsel %vm51_vm1, %v1104_v51, 0.0 }
 0x607   :  { %1109 = vadd.xlane.f32.xlu0 %v1108_v52  ;;  %2803 = vmatpush3.bf16.msra.mxu0 %v3455_v55 }
 0x608   :  { %2804 = vmatprep.subr.bf16.mxu0 %v3059_v0 }
 0x60b   :  { %2805 = vmatpush3.bf16.msra.mxu0 %v3445_v7 }
 0x60c   :  { %2818 = vmatprep.subr.bf16.mxu0 %v3059_v0 }
 0x614   :  { %1236 = vrot.lane.b32.xlu1 %v3445_v7, %s3064_s25 }
 0x68c   :  { %v1107_v56 = vpop.xlane.xlu1 %1106 }
 0x68d   :  { %v1112_v58 = vmul.f32 0.03125, %v1107_v56 }
 0x68f   :  { %v1114_v59 = vsub.f32 %v1103_v37, %v1112_v58 }
 0x690   :  { %v1110_v4 = vpop.xlane.xlu0 %1109  ;;  %v1237_v10 = vpop.permute.xlu1 %1236 }
 0x691   :  { %v1113_v60 = vmul.f32 0.03125, %v1110_v4  ;;  %v1116_v61 = vmul.f32 %v1114_v59, %v1114_v59 }
 0x693   :  { %v1115_v63 = vsub.f32 %v1104_v51, %v1113_v60  ;;  %v1118_v2 = vsel %vm51_vm1, %v1116_v61, 0.0 }
 0x694   :  { %1119 = vadd.xlane.f32.xlu0 %v1118_v2 }
 0x695   :  { %v1117_v35 = vmul.f32 %v1115_v63, %v1115_v63 }
 0x697   :  { %v1121_v3 = vsel %vm51_vm1, %v1117_v35, 0.0 }
 0x698   :  { %1122 = vadd.xlane.f32.xlu1 %v1121_v3 }
 0x6a9   :  { %1133 = vrot.lane.b32.xlu1 %v1050_v46, %s3064_s25 }
 0x6aa   :  { %1238 = vrot.lane.b32.xlu0 %v3455_v55, %s3064_s25 }
 0x6ad   :  { %1243 = vrot.lane.b32.xlu1 %v3474_v9, %s3064_s25 }
 0x6ae   :  { %1138 = vrot.lane.b32.xlu0 %v1050_v46, %s3065_s26 }
 0x71d   :  { %v1120_v14 = vpop.xlane.xlu0 %1119 }
 0x71e   :  { %v1124_v16 = vmul.f32 0.03125, %v1120_v14 }
 0x720   :  { %v1126_v27 = vadd.f32 1e-05, %v1124_v16 }
 0x721   :  { %v1123_v17 = vpop.xlane.xlu1 %1122  ;;  %v1239_v24 = vpop.permute.xlu0 %1238 }
 0x722   :  { %3015 = vrsqrt.f32 %v1126_v27  ;;  %v1125_v18 = vmul.f32 0.03125, %v1123_v17  ;;  %2811 = vmatpush3.bf16.msra.mxu1 %v1239_v24 }
 0x723   :  { %2812 = vmatprep.subr.bf16.mxu1 %v3059_v0 }
 0x724   :  { %v1127_v21 = vadd.f32 1e-05, %v1125_v18 }
 0x725   :  { %v1134_v15 = vpop.permute.xlu1 %1133  ;;  %v1139_v36 = vpop.permute.xlu0 %1138 }
 0x726   :  { %3017 = vrsqrt.f32 %v1127_v21  ;;  %2813 = vmatpush3.bf16.msra.mxu1 %v1237_v10 }
 0x727   :  { %2824 = vmatprep.subr.bf16.mxu1 %v3059_v0 }
 0x729   :  { %2815 = vmatmul.mubr.msk.bf16.vlgmr.msra.gmra.mxu1 %vm51_vm1, %v1233_v23  ;;  %v1244_v43 = vpop.permute.xlu1 %1243 }
 0x72a   :  { %2826 = vmatprep.mubr.msk.bf16.mxu1 %vm3060_vm0, %v3059_v0 }
 0x72f   :  { %v3016_v1 = vpop.eup %3015 }
 0x730   :  { %v1130_v25 = vmul.f32 %v3016_v1, %v1114_v59 }
 0x732   :  { %v1136_v33 = vmul.f32 %v1134_v15, %v1130_v25 }
 0x733   :  { %v3018_v26 = vpop.eup %3017 }
 0x734   :  { %v1131_v29 = vmul.f32 %v3018_v26, %v1115_v63  ;;  %v3489_v6 = vadd.f32 %v1139_v36, %v1136_v33 }
 0x736   :  { %v1137_v38 = vmul.f32 %v1134_v15, %v1131_v29 }
 0x738   :  { %v3491_v40 = vadd.f32 %v1139_v36, %v1137_v38 }
 0x73a   :  { %v1182_v42 = vpack.c.bf16 %v3491_v40, %v3489_v6 }
 0x73c   :  { %2807 = vmatmul.mubr.msk.bf16.vlgmr.msra.gmra.mxu0 %vm51_vm1, %v1182_v42 }
 0x73d   :  { %2820 = vmatprep.mubr.msk.bf16.mxu0 %vm3060_vm0, %v3059_v0 }
 0x7e9   :  { %v1283_v45 = vpop.f32.mrf.mxu1 }
 0x7ea   :  { %v1284_v46 = vadd.f32 %v1283_v45, %v1244_v43 }
 0x7eb   :  { %v2816_v30 = vpop.f32.mrf.mxu1 }
 0x7ec   :  { %1326 = vrot.lane.b32.xlu1 %v1284_v46, %s3063_s24  ;;  %1320 = vrot.lane.b32.xlu0 %v1284_v46, %s3062_s23  ;;  %v1338_v47 = vpack.c.bf16 %v1284_v46, %v1284_v46 }
 0x7ed   :  { %v1286_v31 = vpop.f32.mrf.mxu1 }
 0x7ee   :  { %v1350_v37 = vsel %vm127_vm2, %v1338_v47, 0  ;;  %v1287_v11 = vadd.f32 %v1286_v31, %v1244_v43 }
 0x7ef   :  { %v2817_v44 = vpop.f32.mrf.mxu1  ;;  %2819 = vmatpush3.bf16.xpose.msra.mxu0 %v1350_v37 }
 0x7f0   :  { %1332 = vrot.lane.b32.xlu1 %v1284_v46, %s3061_s22  ;;  %2830 = vmatprep.subr.bf16.mxu0 %v3059_v0  ;;  %v3533_v10 = vpack.c.bf16 %v1287_v11, %v1287_v11 }
 0x7f2   :  { %v1534_v17 = vsel %vm127_vm2, %v3533_v10, 0 }
 0x7fc   :  { %v1226_v48 = vpop.f32.mrf.mxu0 }
 0x7fd   :  { %v1227_v49 = vadd.f32 %v1226_v48, %v3474_v9 }
 0x7fe   :  { %v2808_v50 = vpop.f32.mrf.mxu0 }
 0x7ff   :  { %v1310_v51 = vpack.c.bf16 %v1227_v49, %v1227_v49  ;;  %1304 = vrot.lane.b32.xlu1 %v1227_v49, %s3061_s22  ;;  %1292 = vrot.lane.b32.xlu0 %v1227_v49, %s3062_s23 }
 0x800   :  { %v1229_v52 = vpop.f32.mrf.mxu0 }
 0x801   :  { %2821 = vmatmul.mubr.msk.bf16.vlgmr.msra.gmra.mxu0 %vm127_vm2, %v1310_v51  ;;  %v1230_v8 = vadd.f32 %v1229_v52, %v3474_v9 }
 0x802   :  { %v2809_v13 = vpop.f32.mrf.mxu0  ;;  %2832 = vmatprep.mubr.msk.bf16.mxu0 %vm3060_vm0, %v3059_v0 }
 0x803   :  { %1298 = vrot.lane.b32.xlu0 %v1227_v49, %s3063_s24  ;;  %1328 = vrot.lane.b32.xlu1 %v1287_v11, %s3063_s24  ;;  %v1314_v25 = vpack.c.bf16 %v1230_v8, %v1230_v8 }
 0x807   :  { %1334 = vrot.lane.b32.xlu1 %v1287_v11, %s3061_s22  ;;  %1322 = vrot.lane.b32.xlu0 %v1287_v11, %s3062_s23 }
 0x80b   :  { %1306 = vrot.lane.b32.xlu1 %v1230_v8, %s3061_s22  ;;  %1294 = vrot.lane.b32.xlu0 %v1230_v8, %s3062_s23 }
 0x80f   :  { %1827 = vrot.lane.b32.xlu1 %v1338_v47, %s3064_s25  ;;  %1300 = vrot.lane.b32.xlu0 %v1230_v8, %s3063_s24  ;;  %v1173_v47 = vld [vmem:[%s3874_s3] sm:$0xff] }
 0x85e   :  { %v1327_v53 = vpop.permute.xlu1 %1326  ;;  %v1321_v56 = vpop.permute.xlu0 %1320 }
 0x85f   :  { %v3518_v58 = vpack.c.bf16 %v1327_v53, %v1327_v53  ;;  %v3520_v59 = vpack.c.bf16 %v1321_v56, %v1321_v56 }
 0x861   :  { %v1442_v4 = vsel %vm127_vm2, %v3518_v58, 0  ;;  %v1396_v60 = vsel %vm127_vm2, %v3520_v59, 0 }
 0x862   :  { %2825 = vmatpush3.bf16.xpose.msra.mxu1 %v1396_v60  ;;  %2831 = vmatpush3.bf16.xpose.msra.mxu0 %v1442_v4  ;;  %v1333_v61 = vpop.permute.xlu1 %1332 }
 0x863   :  { %2836 = vmatprep.subr.bf16.mxu1 %v3059_v0  ;;  %2842 = vmatprep.subr.bf16.mxu0 %v3059_v0  ;;  %v3528_v63 = vpack.c.bf16 %v1333_v61, %v1333_v61 }
 0x865   :  { %v1488_v9 = vsel %vm127_vm2, %v3528_v63, 0 }
 0x871   :  { %v1305_v2 = vpop.permute.xlu1 %1304  ;;  %v1293_v35 = vpop.permute.xlu0 %1292 }
 0x872   :  { %v1311_v3 = vpack.c.bf16 %v1293_v35, %v1293_v35  ;;  %v1313_v57 = vpack.c.bf16 %v1305_v2, %v1305_v2 }
 0x874   :  { %2827 = vmatmul.mubr.msk.bf16.vlgmr.msra.gmra.mxu1 %vm127_vm2, %v1311_v3 }
 0x875   :  { %2837 = vmatpush3.bf16.xpose.msra.mxu1 %v1488_v9  ;;  %v1299_v14 = vpop.permute.xlu0 %1298  ;;  %v1329_v16 = vpop.permute.xlu1 %1328  ;;  %2838 = vmatprep.mubr.msk.bf16.mxu1 %vm3060_vm0, %v3059_v0 }
 0x876   :  { %v1312_v27 = vpack.c.bf16 %v1299_v14, %v1299_v14  ;;  %2848 = vmatprep.subr.bf16.mxu1 %v3059_v0  ;;  %v3546_v21 = vpack.c.bf16 %v1329_v16, %v1329_v16 }
 0x878   :  { %2833 = vmatmul.mubr.msk.bf16.vlgmr.msra.gmra.mxu0 %vm127_vm2, %v1312_v27  ;;  %v1626_v26 = vsel %vm127_vm2, %v3546_v21, 0 }
 0x879   :  { %2843 = vmatpush3.bf16.xpose.msra.mxu0 %v1534_v17  ;;  %v1335_v24 = vpop.permute.xlu1 %1334  ;;  %v1323_v18 = vpop.permute.xlu0 %1322  ;;  %2844 = vmatprep.mubr.msk.bf16.mxu0 %vm3060_vm0, %v3059_v0 }
 0x87a   :  { %v3543_v19 = vpack.c.bf16 %v1323_v18, %v1323_v18  ;;  %2854 = vmatprep.subr.bf16.mxu0 %v3059_v0  ;;  %v3556_v29 = vpack.c.bf16 %v1335_v24, %v1335_v24 }
 0x87c   :  { %v1580_v23 = vsel %vm127_vm2, %v3543_v19, 0  ;;  %2839 = vmatmul.mubr.msk.bf16.vlgmr.msra.gmra.mxu1 %vm127_vm2, %v1313_v57  ;;  %v1672_v38 = vsel %vm127_vm2, %v3556_v29, 0  ;;  %v1174_v57 = vld [vmem:[%s3874_s3 + $0x8] sm:$0xff] }
 0x87d   :  { %2849 = vmatpush3.bf16.xpose.msra.mxu1 %v1580_v23  ;;  %v1295_v1 = vpop.permute.xlu0 %1294  ;;  %2850 = vmatprep.mubr.msk.bf16.mxu1 %vm3060_vm0, %v3059_v0  ;;  %v1307_v15 = vpop.permute.xlu1 %1306 }
 0x87e   :  { %2860 = vmatprep.subr.bf16.mxu1 %v3059_v0  ;;  %v1315_v33 = vpack.c.bf16 %v1295_v1, %v1295_v1  ;;  %v1317_v46 = vpack.c.bf16 %v1307_v15, %v1307_v15 }
 0x880   :  { %2845 = vmatmul.mubr.msk.bf16.vlgmr.msra.gmra.mxu0 %vm127_vm2, %v1314_v25 }
 0x881   :  { %2855 = vmatpush3.bf16.xpose.msra.mxu0 %v1626_v26  ;;  %2856 = vmatprep.mubr.msk.bf16.mxu0 %vm3060_vm0, %v3059_v0  ;;  %v1301_v36 = vpop.permute.xlu0 %1300  ;;  %v1828_v42 = vpop.permute.xlu1 %1827 }
 0x882   :  { %2866 = vmatprep.subr.bf16.mxu0 %v3059_v0  ;;  %v1316_v43 = vpack.c.bf16 %v1301_v36, %v1301_v36  ;;  %v1833_v45 = vsel %vm634_vm3, %v1828_v42, 0 }
 0x884   :  { %2851 = vmatmul.mubr.msk.bf16.vlgmr.msra.gmra.mxu1 %vm127_vm2, %v1315_v33 }
 0x885   :  { %2861 = vmatpush3.bf16.xpose.msra.mxu1 %v1672_v38  ;;  %2862 = vmatprep.mubr.msk.bf16.mxu1 %vm3060_vm0, %v3059_v0 }
 0x886   :  { %2872 = vmatprep.subr.bf16.mxu1 %v3059_v0 }
 0x888   :  { %2857 = vmatmul.mubr.msk.bf16.vlgmr.msra.gmra.mxu0 %vm127_vm2, %v1316_v43 }
 0x889   :  { %2867 = vmatpush3.bf16.msra.mxu0 %v1833_v45  ;;  %2868 = vmatprep.mubr.msk.bf16.mxu0 %vm3060_vm0, %v3059_v0 }
 0x88a   :  { %2878 = vmatprep.subr.bf16.mxu0 %v3059_v0 }
 0x88c   :  { %2863 = vmatmul.mubr.msk.bf16.vlgmr.msra.gmra.mxu1 %vm127_vm2, %v1317_v46 }
 0x88d   :  { %2874 = vmatprep.mubr.msk.bf16.mxu1 %vm3060_vm0, %v3059_v0 }
 0x8c1   :  { %v1386_v30 = vpop.f32.mrf.mxu0 }
 0x8c2   :  { %v1714_v31 = vmul.f32 0.35355338, %v1386_v30 }
 0x8c3   :  { %v2822_v37 = vpop.f32.mrf.mxu0 }
 0x8c4   :  { %v3579_v44 = vadd.f32 %v1714_v31, %v1173_v47 }
 0x8c5   :  { %v1389_v48 = vpop.f32.mrf.mxu0 }
 0x8c6   :  { %v1730_v49 = vsel %vm127_vm2, %v3579_v44, -inf }
 0x8c7   :  { %v2823_v50 = vpop.f32.mrf.mxu0  ;;  %1731 = vmax.xlane.f32.xlu0 %v1730_v49 }
 0x934   :  { %v1432_v51 = vpop.f32.mrf.mxu1 }
 0x935   :  { %v1715_v52 = vmul.f32 0.35355338, %v1432_v51 }
 0x936   :  { %v2828_v11 = vpop.f32.mrf.mxu1 }
 0x937   :  { %v3583_v13 = vadd.f32 %v1715_v52, %v1173_v47 }
 0x938   :  { %v1435_v8 = vpop.f32.mrf.mxu1  ;;  %v1478_v53 = vpop.f32.mrf.mxu0 }
 0x939   :  { %v1716_v56 = vmul.f32 0.35355338, %v1478_v53  ;;  %v1733_v4 = vsel %vm127_vm2, %v3583_v13, -inf }
 0x93a   :  { %v2834_v60 = vpop.f32.mrf.mxu0  ;;  %1734 = vmax.xlane.f32.xlu1 %v1733_v4  ;;  %v2829_v61 = vpop.f32.mrf.mxu1 }
 0x93b   :  { %v1724_v2 = vadd.f32 %v1716_v56, %v1173_v47 }
 0x93c   :  { %v1481_v35 = vpop.f32.mrf.mxu0  ;;  %v1524_v3 = vpop.f32.mrf.mxu1 }
 0x93d   :  { %v1717_v9 = vmul.f32 0.35355338, %v1524_v3  ;;  %v1736_v14 = vsel %vm127_vm2, %v1724_v2, -inf }
 0x93e   :  { %v2835_v16 = vpop.f32.mrf.mxu0  ;;  %1737 = vmax.xlane.f32.xlu0 %v1736_v14  ;;  %v2840_v27 = vpop.f32.mrf.mxu1 }
 0x93f   :  { %v1725_v17 = vadd.f32 %v1717_v9, %v1173_v47 }
 0x940   :  { %v1527_v24 = vpop.f32.mrf.mxu1  ;;  %v1570_v18 = vpop.f32.mrf.mxu0 }
 0x941   :  { %v1718_v23 = vmul.f32 0.35355338, %v1570_v18  ;;  %v1739_v1 = vsel %vm127_vm2, %v1725_v17, -inf }
 0x942   :  { %v2846_v25 = vpop.f32.mrf.mxu0  ;;  %1740 = vmax.xlane.f32.xlu0 %v1739_v1  ;;  %v2841_v15 = vpop.f32.mrf.mxu1 }
 0x943   :  { %v3592_v26 = vadd.f32 %v1718_v23, %v1174_v57 }
 0x944   :  { %v1573_v33 = vpop.f32.mrf.mxu0  ;;  %v1616_v36 = vpop.f32.mrf.mxu1 }
 0x945   :  { %v1719_v38 = vmul.f32 0.35355338, %v1616_v36  ;;  %v1742_v42 = vsel %vm127_vm2, %v3592_v26, -inf }
 0x946   :  { %v2847_v43 = vpop.f32.mrf.mxu0  ;;  %1743 = vmax.xlane.f32.xlu1 %v1742_v42  ;;  %v2852_v45 = vpop.f32.mrf.mxu1 }
 0x947   :  { %v3596_v46 = vadd.f32 %v1719_v38, %v1174_v57 }
 0x948   :  { %v1619_v30 = vpop.f32.mrf.mxu1  ;;  %v1662_v47 = vpop.f32.mrf.mxu0 }
 0x949   :  { %v1720_v31 = vmul.f32 0.35355338, %v1662_v47  ;;  %v1745_v37 = vsel %vm127_vm2, %v3596_v46, -inf }
 0x94a   :  { %v2858_v48 = vpop.f32.mrf.mxu0  ;;  %1746 = vmax.xlane.f32.xlu0 %v1745_v37  ;;  %v2853_v49 = vpop.f32.mrf.mxu1 }
 0x94b   :  { %v1728_v50 = vadd.f32 %v1720_v31, %v1174_v57 }
 0x94c   :  { %v1665_v51 = vpop.f32.mrf.mxu0  ;;  %v1708_v52 = vpop.f32.mrf.mxu1 }
 0x94d   :  { %v1721_v11 = vmul.f32 0.35355338, %v1708_v52  ;;  %v1748_v8 = vsel %vm127_vm2, %v1728_v50, -inf }
 0x94e   :  { %v2859_v53 = vpop.f32.mrf.mxu0  ;;  %1749 = vmax.xlane.f32.xlu1 %v1748_v8  ;;  %v2864_v56 = vpop.f32.mrf.mxu1 }
 0x94f   :  { %v1729_v4 = vadd.f32 %v1721_v11, %v1174_v57 }
 0x950   :  { %v1711_v60 = vpop.f32.mrf.mxu1  ;;  %v1732_v3 = vpop.xlane.xlu0 %1731 }
 0x951   :  { %v1751_v61 = vsel %vm127_vm2, %v1729_v4, -inf  ;;  %v1754_v9 = vsub.f32 %v3579_v44, %v1732_v3 }
 0x952   :  { %1752 = vmax.xlane.f32.xlu0 %v1751_v61  ;;  %v2865_v35 = vpop.f32.mrf.mxu1 }
 0x953   :  { %v1762_v14 = vmul.f32 1.442695, %v1754_v9 }
 0x955   :  { %3019 = vpow2.f32 %v1762_v14 }
 0x95f   :  { %1925 = vrot.lane.b32.xlu1 %v3518_v58, %s3064_s25 }
 0x962   :  { %v3609_v16 = vpop.eup %3019 }
 0x963   :  { %1974 = vrot.lane.b32.xlu1 %v3528_v63, %s3064_s25  ;;  %v1778_v27 = vsel %vm127_vm2, %v3609_v16, 0.0 }
 0x968   :  { %1876 = vrot.lane.b32.xlu0 %v3520_v59, %s3064_s25 }
 0x987   :  { %1779 = vadd.xlane.f32.xlu1 %v1778_v27 }
 0x9c3   :  { %v1735_v24 = vpop.xlane.xlu1 %1734 }
 0x9c4   :  { %v1755_v58 = vsub.f32 %v3583_v13, %v1735_v24 }
 0x9c6   :  { %v1764_v18 = vmul.f32 1.442695, %v1755_v58 }
 0x9c7   :  { %v1738_v57 = vpop.xlane.xlu0 %1737 }
 0x9c8   :  { %3021 = vpow2.f32 %v1764_v18  ;;  %v1756_v63 = vsub.f32 %v1724_v2, %v1738_v57 }
 0x9ca   :  { %v1766_v23 = vmul.f32 1.442695, %v1756_v63 }
 0x9cb   :  { %v1741_v59 = vpop.xlane.xlu0 %1740 }
 0x9cc   :  { %3023 = vpow2.f32 %v1766_v23  ;;  %v1757_v1 = vsub.f32 %v1725_v17, %v1741_v59 }
 0x9ce   :  { %v1768_v44 = vmul.f32 1.442695, %v1757_v1 }
 0x9cf   :  { %v1744_v45 = vpop.xlane.xlu1 %1743 }
 0x9d0   :  { %3025 = vpow2.f32 %v1768_v44  ;;  %v1758_v30 = vsub.f32 %v3592_v26, %v1744_v45 }
 0x9d2   :  { %v1770_v37 = vmul.f32 1.442695, %v1758_v30 }
 0x9d3   :  { %v1747_v33 = vpop.xlane.xlu0 %1746 }
 0x9d4   :  { %v1759_v31 = vsub.f32 %v3596_v46, %v1747_v33  ;;  %3027 = vpow2.f32 %v1770_v37 }
 0x9d5   :  { %v3614_v25 = vpop.eup %3021 }
 0x9d6   :  { %v1781_v15 = vsel %vm127_vm2, %v3614_v25, 0.0  ;;  %v1772_v49 = vmul.f32 1.442695, %v1759_v31 }
 0x9d7   :  { %1782 = vadd.xlane.f32.xlu0 %v1781_v15  ;;  %v1750_v47 = vpop.xlane.xlu1 %1749 }
 0x9d8   :  { %v1760_v48 = vsub.f32 %v1728_v50, %v1750_v47  ;;  %3029 = vpow2.f32 %v1772_v49 }
 0x9d9   :  { %v3618_v36 = vpop.eup %3023 }
 0x9da   :  { %v1784_v13 = vsel %vm127_vm2, %v3618_v36, 0.0  ;;  %v1774_v51 = vmul.f32 1.442695, %v1760_v48 }
 0x9db   :  { %1785 = vadd.xlane.f32.xlu1 %v1784_v13  ;;  %v1753_v2 = vpop.xlane.xlu0 %1752  ;;  %v1926_v8 = vpop.permute.xlu1 %1925 }
 0x9dc   :  { %v1761_v52 = vsub.f32 %v1729_v4, %v1753_v2  ;;  %3031 = vpow2.f32 %v1774_v51  ;;  %v1931_v14 = vsel %vm634_vm3, %v1926_v8, 0 }
 0x9dd   :  { %v3622_v38 = vpop.eup %3025 }
 0x9de   :  { %v1787_v17 = vsel %vm127_vm2, %v3622_v38, 0.0  ;;  %v1776_v11 = vmul.f32 1.442695, %v1761_v52 }
 0x9df   :  { %1788 = vadd.xlane.f32.xlu0 %v1787_v17  ;;  %v1877_v42 = vpop.permute.xlu0 %1876  ;;  %v1975_v53 = vpop.permute.xlu1 %1974 }
 0x9e0   :  { %v1882_v43 = vsel %vm634_vm3, %v1877_v42, 0  ;;  %3033 = vpow2.f32 %v1776_v11  ;;  %v1980_v63 = vsel %vm634_vm3, %v1975_v53, 0 }
 0x9e1   :  { %2873 = vmatpush3.bf16.msra.mxu1 %v1882_v43 }
 0x9e2   :  { %2884 = vmatprep.subr.bf16.mxu1 %v3059_v0 }
 0x9ec   :  { %2072 = vrot.lane.b32.xlu1 %v3543_v19, %s3064_s25  ;;  %v3634_v19 = vpop.eup %3027 }
 0x9ed   :  { %v1790_v26 = vsel %vm127_vm2, %v3634_v19, 0.0 }
 0x9f5   :  { %2023 = vrot.lane.b32.xlu0 %v3533_v10, %s3064_s25  ;;  %v3636_v10 = vpop.eup %3029 }
 0x9f6   :  { %v3640_v46 = vpop.eup %3031  ;;  %v1793_v4 = vsel %vm127_vm2, %v3636_v10, 0.0 }
 0x9f7   :  { %v1796_v56 = vsel %vm127_vm2, %v3640_v46, 0.0  ;;  %v3646_v60 = vpop.eup %3033 }
 0x9f8   :  { %v1799_v61 = vsel %vm127_vm2, %v3646_v60, 0.0 }
 0xa10   :  { %1791 = vadd.xlane.f32.xlu1 %v1790_v26  ;;  %v1780_v50 = vpop.xlane.xlu1 %1779 }
 0xa11   :  { %3035 = vrcp.f32 %v1780_v50 }
 0xa14   :  { %1797 = vadd.xlane.f32.xlu1 %v1796_v56  ;;  %1794 = vadd.xlane.f32.xlu0 %v1793_v4 }
 0xa18   :  { %1800 = vadd.xlane.f32.xlu0 %v1799_v61 }
 0xa1e   :  { %v3036_v35 = vpop.eup %3035 }
 0xa1f   :  { %v3651_v3 = vmul.f32 %v3036_v35, %v3609_v16 }
 0xa21   :  { %v1818_v9 = vpack.c.bf16 %v3651_v3, %v3651_v3 }
 0xa23   :  { %2869 = vmatmul.mubr.msk.bf16.vlgmr.msra.gmra.mxu0 %vm127_vm2, %v1818_v9 }
 0xa24   :  { %2879 = vmatpush3.bf16.msra.mxu0 %v1931_v14  ;;  %2880 = vmatprep.mubr.msk.bf16.mxu0 %vm3060_vm0, %v3059_v0 }
 0xa25   :  { %2170 = vrot.lane.b32.xlu1 %v3556_v29, %s3064_s25  ;;  %2890 = vmatprep.subr.bf16.mxu0 %v3059_v0 }
 0xa2e   :  { %2121 = vrot.lane.b32.xlu0 %v3546_v21, %s3064_s25 }
 0xa32   :  { %2255 = vrot.lane.b32.xlu0 %v3455_v55, %s3066_s2 }
 0xa60   :  { %v1783_v16 = vpop.xlane.xlu0 %1782 }
 0xa61   :  { %3037 = vrcp.f32 %v1783_v16 }
 0xa64   :  { %v1786_v27 = vpop.xlane.xlu1 %1785 }
 0xa65   :  { %3039 = vrcp.f32 %v1786_v27 }
 0xa68   :  { %v1789_v24 = vpop.xlane.xlu0 %1788 }
 0xa69   :  { %3041 = vrcp.f32 %v1789_v24 }
 0xa6c   :  { %v2024_v21 = vpop.permute.xlu0 %2023 }
 0xa6d   :  { %v2029_v1 = vsel %vm634_vm3, %v2024_v21, 0 }
 0xa6e   :  { %v3038_v58 = vpop.eup %3037 }
 0xa6f   :  { %v3667_v18 = vmul.f32 %v3038_v58, %v3614_v25  ;;  %v2073_v25 = vpop.permute.xlu1 %2072 }
 0xa70   :  { %v2078_v33 = vsel %vm634_vm3, %v2073_v25, 0 }
 0xa71   :  { %v1819_v29 = vpack.c.bf16 %v3667_v18, %v3667_v18 }
 0xa72   :  { %v3040_v57 = vpop.eup %3039 }
 0xa73   :  { %2875 = vmatmul.mubr.msk.bf16.vlgmr.msra.gmra.mxu1 %vm127_vm2, %v1819_v29  ;;  %v3674_v55 = vmul.f32 %v3040_v57, %v3618_v36 }
 0xa74   :  { %2885 = vmatpush3.bf16.msra.mxu1 %v1980_v63  ;;  %2886 = vmatprep.mubr.msk.bf16.mxu1 %vm3060_vm0, %v3059_v0 }
 0xa75   :  { %v1820_v23 = vpack.c.bf16 %v3674_v55, %v3674_v55  ;;  %2896 = vmatprep.subr.bf16.mxu1 %v3059_v0 }
 0xa76   :  { %v3042_v59 = vpop.eup %3041 }
 0xa77   :  { %2881 = vmatmul.mubr.msk.bf16.vlgmr.msra.gmra.mxu0 %vm127_vm2, %v1820_v23  ;;  %v3684_v44 = vmul.f32 %v3042_v59, %v3622_v38 }
 0xa78   :  { %2891 = vmatpush3.bf16.msra.mxu0 %v2029_v1  ;;  %2892 = vmatprep.mubr.msk.bf16.mxu0 %vm3060_vm0, %v3059_v0 }
 0xa79   :  { %v1821_v15 = vpack.c.bf16 %v3684_v44, %v3684_v44  ;;  %2902 = vmatprep.subr.bf16.mxu0 %v3059_v0 }
 0xa7b   :  { %2887 = vmatmul.mubr.msk.bf16.vlgmr.msra.gmra.mxu1 %vm127_vm2, %v1821_v15 }
 0xa7c   :  { %2897 = vmatpush3.bf16.msra.mxu1 %v2078_v33  ;;  %2898 = vmatprep.mubr.msk.bf16.mxu1 %vm3060_vm0, %v3059_v0 }
 0xa7d   :  { %2908 = vmatprep.subr.bf16.mxu1 %v3059_v0 }
 0xa99   :  { %v1792_v36 = vpop.xlane.xlu1 %1791 }
 0xa9a   :  { %3043 = vrcp.f32 %v1792_v36 }
 0xa9d   :  { %v1798_v13 = vpop.xlane.xlu1 %1797  ;;  %v1795_v2 = vpop.xlane.xlu0 %1794 }
 0xa9e   :  { %3045 = vrcp.f32 %v1798_v13 }
 0xa9f   :  { %3047 = vrcp.f32 %v1795_v2 }
 0xaa1   :  { %v1801_v38 = vpop.xlane.xlu0 %1800  ;;  %v2171_v48 = vpop.permute.xlu1 %2170 }
 0xaa2   :  { %3049 = vrcp.f32 %v1801_v38  ;;  %v2176_v11 = vsel %vm634_vm3, %v2171_v48, 0 }
 0xaa5   :  { %v2122_v43 = vpop.permute.xlu0 %2121 }
 0xaa6   :  { %v2127_v31 = vsel %vm634_vm3, %v2122_v43, 0 }
 0xaa7   :  { %v3044_v17 = vpop.eup %3043 }
 0xaa8   :  { %v3697_v42 = vmul.f32 %v3044_v17, %v3634_v19 }
 0xaa9   :  { %v2256_v56 = vpop.permute.xlu0 %2255 }
 0xaaa   :  { %v1822_v45 = vpack.c.bf16 %v3697_v42, %v3697_v42 }
 0xaab   :  { %v3046_v30 = vpop.eup %3045 }
 0xaac   :  { %v3048_v47 = vpop.eup %3047  ;;  %2893 = vmatmul.mubr.msk.bf16.vlgmr.msra.gmra.mxu0 %vm127_vm2, %v1822_v45  ;;  %v3709_v49 = vmul.f32 %v3046_v30, %v3640_v46 }
 0xaad   :  { %2903 = vmatpush3.bf16.msra.mxu0 %v2127_v31  ;;  %v3704_v37 = vmul.f32 %v3048_v47, %v3636_v10  ;;  %2904 = vmatprep.mubr.msk.bf16.mxu0 %vm3060_vm0, %v3059_v0 }
 0xaae   :  { %2914 = vmatprep.subr.bf16.mxu0 %v3059_v0  ;;  %v1824_v8 = vpack.c.bf16 %v3709_v49, %v3709_v49 }
 0xaaf   :  { %v1823_v51 = vpack.c.bf16 %v3704_v37, %v3704_v37  ;;  %v3050_v52 = vpop.eup %3049 }
 0xab0   :  { %v3721_v19 = vmul.f32 %v3050_v52, %v3646_v60 }
 0xab1   :  { %2899 = vmatmul.mubr.msk.bf16.vlgmr.msra.gmra.mxu1 %vm127_vm2, %v1823_v51 }
 0xab2   :  { %2909 = vmatpush3.bf16.msra.mxu1 %v2176_v11  ;;  %2910 = vmatprep.mubr.msk.bf16.mxu1 %vm3060_vm0, %v3059_v0  ;;  %v1825_v53 = vpack.c.bf16 %v3721_v19, %v3721_v19 }
 0xab3   :  { %2922 = vmatprep.subr.bf16.mxu1 %v3059_v0 }
 0xab4   :  { %2905 = vmatmul.mubr.msk.bf16.vlgmr.msra.gmra.mxu0 %vm127_vm2, %v1824_v8 }
 0xab5   :  { %2918 = vmatprep.mubr.msk.bf16.mxu0 %vm3060_vm0, %v3059_v0  ;;  %2915 = vmatpush3.bf16.msra.mxu0 %v2256_v56 }
 0xab6   :  { %2916 = vmatprep.subr.bf16.mxu0 %v3059_v0 }
 0xab9   :  { %2911 = vmatmul.mubr.msk.bf16.vlgmr.msra.gmra.mxu1 %vm127_vm2, %v1825_v53 }
 0xaba   :  { %2926 = vmatprep.mubr.msk.bf16.mxu1 %vm3060_vm0, %v3059_v0 }
 0xae3   :  { %v1869_v10 = vpop.f32.mrf.mxu0 }
 0xae5   :  { %v2870_v26 = vpop.f32.mrf.mxu0 }
 0xae7   :  { %v1872_v46 = vpop.f32.mrf.mxu0 }
 0xae9   :  { %v2871_v50 = vpop.f32.mrf.mxu0 }
 0xb33   :  { %v1918_v4 = vpop.f32.mrf.mxu1 }
 0xb35   :  { %v2876_v60 = vpop.f32.mrf.mxu1 }
 0xb37   :  { %v1921_v61 = vpop.f32.mrf.mxu1  ;;  %v1967_v35 = vpop.f32.mrf.mxu0 }
 0xb39   :  { %v2877_v9 = vpop.f32.mrf.mxu1  ;;  %v2882_v14 = vpop.f32.mrf.mxu0 }
 0xb3b   :  { %v1970_v16 = vpop.f32.mrf.mxu0  ;;  %v2016_v27 = vpop.f32.mrf.mxu1 }
 0xb3d   :  { %v2883_v24 = vpop.f32.mrf.mxu0  ;;  %v2888_v58 = vpop.f32.mrf.mxu1 }
 0xb3f   :  { %v2019_v29 = vpop.f32.mrf.mxu1 }
 0xb41   :  { %v2889_v57 = vpop.f32.mrf.mxu1 }
 0xb6c   :  { %v2065_v63 = vpop.f32.mrf.mxu0 }
 0xb6e   :  { %v2894_v21 = vpop.f32.mrf.mxu0 }
 0xb70   :  { %v2068_v23 = vpop.f32.mrf.mxu0 }
 0xb71   :  { %v2114_v59 = vpop.f32.mrf.mxu1 }
 0xb72   :  { %v2968_v1 = vpack.i.bf16 %v2114_v59, %v1918_v4  ;;  %v2895_v25 = vpop.f32.mrf.mxu0 }
 0xb73   :  { %v2900_v15 = vpop.f32.mrf.mxu1 }
 0xb74   :  { %2969 = vrot.lane.b32.xlu1 %v2968_v1, %s3067_s10  ;;  %v2163_v33 = vpop.f32.mrf.mxu0 }
 0xb75   :  { %v2117_v36 = vpop.f32.mrf.mxu1  ;;  %v2973_v13 = vpack.i.bf16 %v2163_v33, %v1967_v35 }
 0xb76   :  { %v2906_v2 = vpop.f32.mrf.mxu0 }
 0xb77   :  { %v2901_v38 = vpop.f32.mrf.mxu1  ;;  %2974 = vrot.lane.b32.xlu0 %v2973_v13, %s3068_s11 }
 0xb78   :  { %v2166_v17 = vpop.f32.mrf.mxu0 }
 0xb79   :  { %v2212_v43 = vpop.f32.mrf.mxu1 }
 0xb7a   :  { %v2978_v45 = vpack.i.bf16 %v2212_v43, %v2016_v27  ;;  %v2907_v30 = vpop.f32.mrf.mxu0  ;;  %v2375_v43 = vld [vmem:[%s3875_s6 + $0x18] sm:$0xff] }
 0xb7b   :  { %v2912_v47 = vpop.f32.mrf.mxu1  ;;  %2253 = vrot.lane.b32.xlu0 %v3445_v7, %s3066_s2  ;;  %v2372_v30 = vld [vmem:[%s3875_s6] sm:$0xff] }
 0xb7c   :  { %2979 = vrot.lane.b32.xlu1 %v2978_v45, %s3069_s12  ;;  %v2373_v47 = vld [vmem:[%s3875_s6 + $0x8] sm:$0xff] }
 0xb7d   :  { %v2215_v31 = vpop.f32.mrf.mxu1 }
 0xb7e   :  { %v2386_v31 = vpack.c.bf16 %v2373_v47, %v2372_v30 }
 0xb7f   :  { %v2913_v48 = vpop.f32.mrf.mxu1 }
 0xb80   :  { %v2382_v48 = vld [vmem:[%s3876_s7 + $0x30] sm:$0xff] }
 0xbe6   :  { %v2970_v51 = vpop.permute.xlu1 %2969 }
 0xbe7   :  { %v2972_v11 = vunpack.i.h.bf16 %v2970_v51  ;;  %v2971_v8 = vunpack.i.l.bf16 %v2970_v51  ;;  %v2383_v51 = vld [vmem:[%s3876_s7 + $0x38] sm:$0xff] }
 0xbe9   :  { %v2975_v52 = vpop.permute.xlu0 %2974  ;;  %v2243_v56 = vsel %vm127_vm2, %v2065_v63, %v2972_v11  ;;  %v2242_v4 = vsel %vm127_vm2, %v1869_v10, %v2971_v8  ;;  %v2252_v10 = vrot.slane %v3470_v5, %v3431_v41  ;;  %v2442_v11 = vpack.c.bf16 %v2383_v51, %v2382_v48 }
 0xbea   :  { %v2977_v53 = vunpack.i.h.bf16 %v2975_v52  ;;  %v2976_v26 = vunpack.i.l.bf16 %v2975_v52  ;;  %v3780_v52 = vld [vmem:[%s3877_s8] sm:$0x3] }
 0xbeb   :  { %v2391_v8 = vrot.slane %v3780_v52, %v3164_v12 }
 0xbec   :  { %v2244_v7 = vsel %vm1040_vm4, %v2242_v4, %v2976_v26  ;;  %v2245_v35 = vsel %vm1040_vm4, %v2243_v56, %v2977_v53 }
 0xbed   :  { %v2254_v46 = vpop.permute.xlu0 %2253 }
 0xbee   :  { %v2980_v50 = vpop.permute.xlu1 %2979  ;;  %2917 = vmatpush3.bf16.msra.mxu0 %v2254_v46 }
 0xbef   :  { %v2982_v60 = vunpack.i.h.bf16 %v2980_v50  ;;  %v2981_v61 = vunpack.i.l.bf16 %v2980_v50  ;;  %2930 = vmatprep.subr.bf16.mxu0 %v3059_v0 }
 0xbf1   :  { %v2247_v9 = vsel %vm1043_vm5, %v2245_v35, %v2982_v60  ;;  %v2246_v14 = vsel %vm1043_vm5, %v2244_v7, %v2981_v61 }
 0xbf2   :  { %v2248_v16 = vpack.c.bf16 %v2247_v9, %v2246_v14 }
 0xbf4   :  { %2919 = vmatmul.mubr.msk.bf16.vlgmr.msra.gmra.mxu0 %vm51_vm1, %v2248_v16 }
 0xbf5   :  { %2938 = vmatprep.mubr.msk.bf16.mxu0 %vm3060_vm0, %v3059_v0  ;;  %2931 = vmatpush3.bf16.msra.mxu0 %v2442_v11 }
 0xbf6   :  { %2932 = vmatprep.subr.bf16.mxu0 %v3059_v0 }
 0xcb4   :  { %v2296_v27 = vpop.f32.mrf.mxu0 }
 0xcb5   :  { %v2297_v24 = vadd.f32 %v2296_v27, %v2252_v10 }
 0xcb6   :  { %v2920_v58 = vpop.f32.mrf.mxu0 }
 0xcb7   :  { %v2303_v29 = vadd.f32 %v2297_v24, %v3489_v6  ;;  %v2380_v58 = vld [vmem:[%s3876_s7 + $0x20] sm:$0xff] }
 0xcb8   :  { %v2299_v57 = vpop.f32.mrf.mxu0 }
 0xcb9   :  { %v2300_v63 = vadd.f32 %v2299_v57, %v2252_v10  ;;  %v2305_v21 = vsel %vm51_vm1, %v2303_v29, 0.0 }
 0xcba   :  { %2306 = vadd.xlane.f32.xlu1 %v2305_v21  ;;  %v2921_v23 = vpop.f32.mrf.mxu0  ;;  %v2379_v21 = vld [vmem:[%s3876_s7 + $0x18] sm:$0xff] }
 0xcbb   :  { %v2304_v59 = vadd.f32 %v2300_v63, %v3491_v40  ;;  %v2374_v40 = vld [vmem:[%s3875_s6 + $0x10] sm:$0xff] }
 0xcbc   :  { %v2387_v45 = vpack.c.bf16 %v2375_v43, %v2374_v40  ;;  %v2378_v63 = vld [vmem:[%s3876_s7 + $0x10] sm:$0xff] }
 0xcbd   :  { %v2308_v1 = vsel %vm51_vm1, %v2304_v59, 0.0  ;;  %v2440_v23 = vpack.c.bf16 %v2379_v21, %v2378_v63 }
 0xcbe   :  { %2309 = vadd.xlane.f32.xlu0 %v2308_v1  ;;  %2923 = vmatpush3.bf16.msra.mxu1 %v2387_v45  ;;  %v2377_v1 = vld [vmem:[%s3876_s7 + $0x8] sm:$0xff] }
 0xcbf   :  { %2924 = vmatprep.subr.bf16.mxu1 %v3059_v0 }
 0xcc2   :  { %2925 = vmatpush3.bf16.msra.mxu1 %v2386_v31 }
 0xd43   :  { %v2307_v25 = vpop.xlane.xlu1 %2306 }
 0xd44   :  { %v2311_v15 = vmul.f32 0.03125, %v2307_v25 }
 0xd46   :  { %v2313_v33 = vsub.f32 %v2303_v29, %v2311_v15  ;;  %v2381_v29 = vld [vmem:[%s3876_s7 + $0x28] sm:$0xff] }
 0xd47   :  { %v2310_v5 = vpop.xlane.xlu0 %2309  ;;  %v2441_v57 = vpack.c.bf16 %v2381_v29, %v2380_v58 }
 0xd48   :  { %v2312_v36 = vmul.f32 0.03125, %v2310_v5  ;;  %v2315_v13 = vmul.f32 %v2313_v33, %v2313_v33 }
 0xd49   :  { %2933 = vmatpush3.bf16.msra.mxu0 %v2441_v57 }
 0xd4a   :  { %v2314_v2 = vsub.f32 %v2304_v59, %v2312_v36  ;;  %v2317_v6 = vsel %vm51_vm1, %v2315_v13, 0.0  ;;  %2934 = vmatprep.subr.bf16.mxu0 %v3059_v0  ;;  %v2376_v59 = vld [vmem:[%s3876_s7] sm:$0xff] }
 0xd4b   :  { %2318 = vadd.xlane.f32.xlu0 %v2317_v6  ;;  %v2439_v25 = vpack.c.bf16 %v2377_v1, %v2376_v59 }
 0xd4c   :  { %v2316_v38 = vmul.f32 %v2314_v2, %v2314_v2 }
 0xd4d   :  { %2935 = vmatpush3.bf16.msra.mxu0 %v2440_v23 }
 0xd4e   :  { %v2320_v17 = vsel %vm51_vm1, %v2316_v38, 0.0  ;;  %2936 = vmatprep.subr.bf16.mxu0 %v3059_v0 }
 0xd4f   :  { %2321 = vadd.xlane.f32.xlu1 %v2320_v17 }
 0xd51   :  { %2937 = vmatpush3.bf16.msra.mxu0 %v2439_v25 }
 0xd60   :  { %2337 = vrot.lane.b32.xlu1 %v2252_v10, %s3065_s26 }
 0xd61   :  { %2332 = vrot.lane.b32.xlu0 %v2252_v10, %s3064_s25 }
 0xd64   :  { %2444 = vrot.lane.b32.xlu1 %v2391_v8, %s3065_s26 }
 0xdd4   :  { %v2319_v53 = vpop.xlane.xlu0 %2318 }
 0xdd5   :  { %v2323_v26 = vmul.f32 0.03125, %v2319_v53 }
 0xdd7   :  { %v2325_v46 = vadd.f32 1e-05, %v2323_v26 }
 0xdd8   :  { %v2322_v50 = vpop.xlane.xlu1 %2321  ;;  %v2333_v7 = vpop.permute.xlu0 %2332 }
 0xdd9   :  { %3051 = vrsqrt.f32 %v2325_v46  ;;  %v2324_v56 = vmul.f32 0.03125, %v2322_v50 }
 0xddb   :  { %v2326_v4 = vadd.f32 1e-05, %v2324_v56 }
 0xddc   :  { %v2338_v12 = vpop.permute.xlu1 %2337 }
 0xddd   :  { %3053 = vrsqrt.f32 %v2326_v4 }
 0xde0   :  { %v2445_v17 = vpop.permute.xlu1 %2444 }
 0xde6   :  { %v3052_v60 = vpop.eup %3051 }
 0xde7   :  { %v2329_v61 = vmul.f32 %v3052_v60, %v2313_v33 }
 0xde9   :  { %v2335_v14 = vmul.f32 %v2333_v7, %v2329_v61  ;;  %v2523_v61 = vrot.slane %v3780_v52, %v3431_v41 }
 0xdea   :  { %v3054_v35 = vpop.eup %3053 }
 0xdeb   :  { %v2330_v9 = vmul.f32 %v3054_v35, %v2314_v2  ;;  %v2340_v10 = vadd.f32 %v2338_v12, %v2335_v14 }
 0xded   :  { %v2336_v16 = vmul.f32 %v2333_v7, %v2330_v9 }
 0xdef   :  { %v2341_v27 = vadd.f32 %v2338_v12, %v2336_v16 }
 0xdf1   :  { %v2385_v24 = vpack.c.bf16 %v2341_v27, %v2340_v10 }
 0xdf3   :  { %2927 = vmatmul.mubr.msk.bf16.vlgmr.msra.gmra.mxu1 %vm51_vm1, %v2385_v24 }
 0xeb3   :  { %v2429_v15 = vpop.f32.mrf.mxu1 }
 0xeb4   :  { %v2430_v5 = vadd.f32 %v2429_v15, %v2391_v8 }
 0xeb5   :  { %v2928_v33 = vpop.f32.mrf.mxu1 }
 0xeb6   :  { %v2436_v6 = vmax.f32 %v2430_v5, 0.0 }
 0xeb7   :  { %v2432_v36 = vpop.f32.mrf.mxu1 }
 0xeb8   :  { %v2433_v13 = vadd.f32 %v2432_v36, %v2391_v8 }
 0xeb9   :  { %v2929_v2 = vpop.f32.mrf.mxu1 }
 0xeba   :  { %v2437_v38 = vmax.f32 %v2433_v13, 0.0 }
 0xebc   :  { %v2438_v0 = vpack.c.bf16 %v2437_v38, %v2436_v6 }
 0xebe   :  { %2939 = vmatmul.mubr.msk.bf16.vlgmr.msra.gmra.mxu0 %vm2447_vm6, %v2438_v0 }
 0xf7e   :  { %v2485_v40 = vpop.f32.mrf.mxu0 }
 0xf7f   :  { %v2486_v43 = vadd.f32 %v2485_v40, %v2445_v17 }
 0xf80   :  { %v2940_v45 = vpop.f32.mrf.mxu0 }
 0xf81   :  { %v2492_v30 = vadd.f32 %v2486_v43, %v2340_v10 }
 0xf82   :  { %v2488_v47 = vpop.f32.mrf.mxu0 }
 0xf83   :  { %v2489_v31 = vadd.f32 %v2488_v47, %v2445_v17  ;;  %v2494_v48 = vsel %vm51_vm1, %v2492_v30, 0.0 }
 0xf84   :  { %2495 = vadd.xlane.f32.xlu0 %v2494_v48  ;;  %v2941_v51 = vpop.f32.mrf.mxu0 }
 0xf85   :  { %v2493_v11 = vadd.f32 %v2489_v31, %v2341_v27 }
 0xf87   :  { %v2497_v8 = vsel %vm51_vm1, %v2493_v11, 0.0 }
 0xf88   :  { %2498 = vadd.xlane.f32.xlu1 %v2497_v8 }
 0xf99   :  { %1147 = vrot.lane.b32.xlu1 %v3384_v22, %s3067_s10 }
 0xf9a   :  { %1145 = vrot.lane.b32.xlu0 %v3347_v62, %s3067_s10 }
 0xf9d   :  { %1155 = vrot.lane.b32.xlu1 %v3391_v32, %s3068_s11 }
 0xf9e   :  { %1153 = vrot.lane.b32.xlu0 %v3354_v34, %s3068_s11 }
 0xfa1   :  { %2346 = vrot.lane.b32.xlu1 %v3704_v37, %s3067_s10 }
 0xfa2   :  { %2344 = vrot.lane.b32.xlu0 %v3667_v18, %s3067_s10 }
 0xfa5   :  { %1163 = vrot.lane.b32.xlu1 %v3401_v39, %s3069_s12 }
 0xfa6   :  { %1161 = vrot.lane.b32.xlu0 %v3364_v28, %s3069_s12 }
 0xfa9   :  { %2354 = vrot.lane.b32.xlu1 %v3709_v49, %s3068_s11 }
 0xfaa   :  { %2352 = vrot.lane.b32.xlu0 %v3674_v55, %s3068_s11 }
 0xfad   :  { %2362 = vrot.lane.b32.xlu1 %v3721_v19, %s3069_s12 }
 0xfae   :  { %2360 = vrot.lane.b32.xlu0 %v3684_v44, %s3069_s12 }
0x100d   :  { %v2496_v62 = vpop.xlane.xlu0 %2495 }
0x100e   :  { %v2500_v34 = vmul.f32 0.03125, %v2496_v62 }
0x1010   :  { %v2502_v22 = vsub.f32 %v2492_v30, %v2500_v34 }
0x1011   :  { %v1146_v32 = vpop.permute.xlu0 %1145  ;;  %v2499_v39 = vpop.xlane.xlu1 %2498 }
0x1012   :  { %v2501_v18 = vmul.f32 0.03125, %v2499_v39  ;;  %v2504_v37 = vmul.f32 %v2502_v22, %v2502_v22  ;;  %v1167_v7 = vsel %vm127_vm2, %v3333_v54, %v1146_v32 }
0x1014   :  { %v2503_v28 = vsub.f32 %v2493_v11, %v2501_v18  ;;  %v2506_v53 = vsel %vm51_vm1, %v2504_v37, 0.0 }
0x1015   :  { %2507 = vadd.xlane.f32.xlu0 %v2506_v53  ;;  %v1154_v49 = vpop.permute.xlu0 %1153  ;;  %v1148_v26 = vpop.permute.xlu1 %1147 }
0x1016   :  { %v2505_v55 = vmul.f32 %v2503_v28, %v2503_v28  ;;  %v1169_v35 = vsel %vm1040_vm4, %v1167_v7, %v1154_v49  ;;  %v1168_v10 = vsel %vm127_vm2, %v3377_v20, %v1148_v26 }
0x1018   :  { %v2509_v46 = vsel %vm51_vm1, %v2505_v55, 0.0 }
0x1019   :  { %v2345_v19 = vpop.permute.xlu0 %2344  ;;  %2510 = vadd.xlane.f32.xlu1 %v2509_v46  ;;  %v1156_v50 = vpop.permute.xlu1 %1155 }
0x101a   :  { %v2366_v16 = vsel %vm127_vm2, %v3651_v3, %v2345_v19  ;;  %v1170_v54 = vsel %vm1040_vm4, %v1168_v10, %v1156_v50 }
0x101d   :  { %v2347_v44 = vpop.permute.xlu1 %2346  ;;  %v1162_v56 = vpop.permute.xlu0 %1161 }
0x101e   :  { %v1171_v9 = vsel %vm1043_vm5, %v1169_v35, %v1162_v56  ;;  %v2367_v3 = vsel %vm127_vm2, %v3697_v42, %v2347_v44 }
0x1021   :  { %v1164_v4 = vpop.permute.xlu1 %1163  ;;  %v2353_v60 = vpop.permute.xlu0 %2352 }
0x1022   :  { %v2368_v41 = vsel %vm1040_vm4, %v2366_v16, %v2353_v60  ;;  %v1172_v27 = vsel %vm1043_vm5, %v1170_v54, %v1164_v4 }
0x1025   :  { %v2355_v14 = vpop.permute.xlu1 %2354  ;;  %v2361_v12 = vpop.permute.xlu0 %2360 }
0x1026   :  { %v2370_v52 = vsel %vm1043_vm5, %v2368_v41, %v2361_v12  ;;  %v2369_v58 = vsel %vm1040_vm4, %v2367_v3, %v2355_v14 }
0x1029   :  { %v2363_v24 = vpop.permute.xlu1 %2362 }
0x102a   :  { %2534 = vrot.lane.b32.xlu1 %v1171_v9, %s3066_s2  ;;  %v2371_v20 = vsel %vm1043_vm5, %v2369_v58, %v2363_v24 }
0x102b   :  { %2527 = vrot.lane.b32.xlu0 %v2523_v61, %s3064_s25 }
0x102e   :  { %2542 = vrot.lane.b32.xlu1 %v2370_v52, %s3065_s26 }
0x102f   :  { %2536 = vrot.lane.b32.xlu0 %v1172_v27, %s3066_s2 }
0x1033   :  { %2544 = vrot.lane.b32.xlu0 %v2371_v20, %s3065_s26 }
0x109e   :  { %v2508_v29 = vpop.xlane.xlu0 %2507 }
0x109f   :  { %v2512_v57 = vmul.f32 0.03125, %v2508_v29 }
0x10a1   :  { %v2514_v63 = vadd.f32 1e-05, %v2512_v57 }
0x10a2   :  { %v2511_v21 = vpop.xlane.xlu1 %2510  ;;  %v2528_v1 = vpop.permute.xlu0 %2527 }
0x10a3   :  { %3055 = vrsqrt.f32 %v2514_v63  ;;  %v2513_v23 = vmul.f32 0.03125, %v2511_v21 }
0x10a5   :  { %v2515_v59 = vadd.f32 1e-05, %v2513_v23 }
0x10a6   :  { %v2535_v33 = vpop.permute.xlu1 %2534  ;;  %v2537_v13 = vpop.permute.xlu0 %2536 }
0x10a7   :  { %3057 = vrsqrt.f32 %v2515_v59 }
0x10aa   :  { %v2543_v0 = vpop.permute.xlu1 %2542  ;;  %v2545_v45 = vpop.permute.xlu0 %2544 }
0x10b0   :  { %v3056_v25 = vpop.eup %3055 }
0x10b1   :  { %v2518_v15 = vmul.f32 %v3056_v25, %v2502_v22 }
0x10b3   :  { %v2524_v5 = vmul.f32 %v2523_v61, %v2518_v15 }
0x10b4   :  { %v3058_v42 = vpop.eup %3057 }
0x10b5   :  { %v2530_v36 = vadd.f32 %v2528_v1, %v2524_v5  ;;  %v2519_v2 = vmul.f32 %v3058_v42, %v2503_v28 }
0x10b7   :  { %v2525_v6 = vmul.f32 %v2523_v61, %v2519_v2  ;;  %v2548_v38 = vsel %vm51_vm1, %v2530_v36, %v2535_v33 }
0x10b8   :  { %v2550_v17 = vsel %vm2447_vm6, %v2548_v38, %v2543_v0 }
0x10b9   :  { %v2531_v40 = vadd.f32 %v2528_v1, %v2525_v6  ;;  %2553 = vst.msk [vmem:[%s3878_s9] sm:$0xff] %vm2552_vm7, %v2550_v17 }
0x10bb   :  { %v2549_v43 = vsel %vm51_vm1, %v2531_v40, %v2537_v13 }
0x10bc   :  { %v2551_v30 = vsel %vm2447_vm6, %v2549_v43, %v2545_v45 }
0x10bd   :  { %2554 = vst.msk [vmem:[%s3878_s9 + $0x8] sm:$0xff] %vm2552_vm7, %v2551_v30 }

</bundles_post_ra>
